<compile_context>
chip_gen: v6e
topology: v6e:2x2x1
jax: 0.10.0
libtpu: 0.0.40
codegen_flags: <defaults>
</compile_context>

<pallas_src>
import functools
import math

import jax
import jax.numpy as jnp
from jax.experimental import pallas as pl
from jax.experimental.pallas import tpu as pltpu


NEG_INF = -1e30  # large finite mask value (avoids inf-inf NaN corner cases)


# ----------------------------------------------------------------------------
# Pallas causal flash-attention kernel
# ----------------------------------------------------------------------------
def _flash_causal_kernel(q_ref, k_ref, v_ref, o_ref,
                         m_sc, l_sc, acc_sc, *, sm_scale, tq, tk):
    qi = pl.program_id(1)
    ki = pl.program_id(2)

    @pl.when(ki == 0)
    def _init():
        m_sc[...] = jnp.full_like(m_sc, NEG_INF)
        l_sc[...] = jnp.zeros_like(l_sc)
        acc_sc[...] = jnp.zeros_like(acc_sc)

    def _accumulate(apply_mask):
        # Trace-time specialization: mask code only emitted for diagonal blocks.
        q = q_ref[...]          # (tq, hd), input dtype (f32 or bf16)
        k = k_ref[...]          # (tk, hd)
        v = v_ref[...]          # (tk, hd)

        # NT matmul on the MXU: contract the last dims directly (no K.T).
        s = jax.lax.dot_general(
            q, k,
            dimension_numbers=(((1,), (1,)), ((), ())),
            preferred_element_type=jnp.float32) * sm_scale        # (tq, tk) f32

        if apply_mask:
            # Causal mask on absolute token indices (diagonal blocks only).
            q_idx = qi * tq + jax.lax.broadcasted_iota(jnp.int32, (tq, tk), 0)
            k_idx = ki * tk + jax.lax.broadcasted_iota(jnp.int32, (tq, tk), 1)
            s = jnp.where(k_idx <= q_idx, s, NEG_INF)

        m_prev = m_sc[...]                                        # (tq, 1)
        m_new = jnp.maximum(m_prev, s.max(axis=-1, keepdims=True))
        alpha = jnp.exp(m_prev - m_new)
        p = jnp.exp(s - m_new)                                    # (tq, tk) f32

        l_sc[...] = alpha * l_sc[...] + p.sum(axis=-1, keepdims=True)
        # p@v in the value dtype (bf16 on real workloads), f32 accumulation.
        acc_sc[...] = alpha * acc_sc[...] + jnp.dot(
            p.astype(v.dtype), v, preferred_element_type=jnp.float32)
        m_sc[...] = m_new

    # Block classification w.r.t. the causal diagonal.
    on_band = ki * tk < (qi + 1) * tq                # has any unmasked entry
    fully_unmasked = (ki + 1) * tk - 1 <= qi * tq    # entirely below diagonal

    @pl.when(fully_unmasked)
    def _below_diag():
        _accumulate(apply_mask=False)

    @pl.when(on_band & jnp.logical_not(fully_unmasked))
    def _diag():
        _accumulate(apply_mask=True)

    # Blocks with on_band == False (fully above the diagonal) are skipped.

    @pl.when(ki == pl.num_programs(2) - 1)
    def _finalize():
        inv_l = pl.reciprocal(l_sc[...], approx=True)
        o_ref[...] = (acc_sc[...] * inv_l).astype(o_ref.dtype)


def flash_causal_attention(q, k, v, *, sm_scale, tq=128, tk=128):
    """q, k, v: (B*H, T, head_dim). Returns (B*H, T, head_dim)."""
    BH, T, hd = q.shape
    tq = min(tq, T)
    tk = min(tk, T)
    assert T % tq == 0 and T % tk == 0, "sequence length must tile evenly"

    kernel = functools.partial(_flash_causal_kernel,
                               sm_scale=sm_scale, tq=tq, tk=tk)

    # K/V index map clamped at the diagonal: for ki > qi the kernel skips the
    # compute, and the clamp keeps the block index unchanged from the previous
    # step so the pipeline does not issue a redundant DMA for those steps.
    kv_map = lambda bh, qi, ki: (bh, jnp.minimum(ki, qi), 0)

    # VMEM footprint with tq=tk=128, hd=128 (double-buffered q/k/v/o + f32
    # scratch) is well under 1 MiB, so the default scoped VMEM limit is fine
    # even on v7x (64 MiB physical).
    return pl.pallas_call(
        kernel,
        out_shape=jax.ShapeDtypeStruct((BH, T, hd), q.dtype),
        grid_spec=pltpu.PrefetchScalarGridSpec(
            num_scalar_prefetch=0,
            grid=(BH, T // tq, T // tk),
            in_specs=[
                # Leading size-1 (batch*head) dim squeezed: kernel refs are 2-D.
                pl.BlockSpec((None, tq, hd), lambda bh, qi, ki: (bh, qi, 0)),
                pl.BlockSpec((None, tk, hd), kv_map),
                pl.BlockSpec((None, tk, hd), kv_map),
            ],
            out_specs=pl.BlockSpec((None, tq, hd),
                                   lambda bh, qi, ki: (bh, qi, 0)),
            scratch_shapes=[
                pltpu.VMEM((tq, 1), jnp.float32),   # running max
                pltpu.VMEM((tq, 1), jnp.float32),   # running denom
                pltpu.VMEM((tq, hd), jnp.float32),  # output accumulator
            ],
        ),
        compiler_params=pltpu.CompilerParams(
            # BH / qi parallel so both v7x TensorCores get work; the reduction
            # (ki) axis is arbitrary (accumulator carried across it).
            dimension_semantics=("parallel", "parallel", "arbitrary")),
    )(q, k, v)


# ----------------------------------------------------------------------------
# Rotary position embedding (standard rotate-half RoPE, theta=10000)
# ----------------------------------------------------------------------------
# TODO(synk): RotaryPositionEmbedding is not defined in the source file;
# standard rotate-half RoPE with base 10000 is used here.
def make_rope_tables(head_dim, context_length):
    inv_freq = 1.0 / (10000.0 ** (jnp.arange(0, head_dim, 2, dtype=jnp.float32)
                                  / head_dim))
    pos = jnp.arange(context_length, dtype=jnp.float32)
    angles = pos[:, None] * inv_freq[None, :]                 # (T, d/2)
    cos = jnp.concatenate([jnp.cos(angles), jnp.cos(angles)], axis=-1)
    sin = jnp.concatenate([jnp.sin(angles), jnp.sin(angles)], axis=-1)
    return cos, sin                                           # (T, d)


def apply_rope(x, cos, sin):
    # x: (b, T, rank, d); cos/sin: (T, d)
    d = x.shape[-1]
    x1, x2 = x[..., : d // 2], x[..., d // 2:]
    rotated = jnp.concatenate([-x2, x1], axis=-1)
    c = cos[None, :, None, :]
    s = sin[None, :, None, :]
    return x * c + rotated * s


# ----------------------------------------------------------------------------
# Tensor Product Attention forward (projections in JAX, attention in Pallas)
# ----------------------------------------------------------------------------
def init_tpa_params(key, embed_dim, num_heads, q_rank, k_rank, v_rank):
    head_dim = embed_dim // num_heads
    keys = jax.random.split(key, 7)
    scale = 0.02
    mk = lambda k, i, o: (scale * jax.random.normal(k, (i, o), jnp.float32))
    return {
        "w_aq": mk(keys[0], embed_dim, q_rank * num_heads),
        "w_ak": mk(keys[1], embed_dim, k_rank * num_heads),
        "w_av": mk(keys[2], embed_dim, v_rank * num_heads),
        "w_bq": mk(keys[3], embed_dim, q_rank * head_dim),
        "w_bk": mk(keys[4], embed_dim, k_rank * head_dim),
        "w_bv": mk(keys[5], embed_dim, v_rank * head_dim),
        "wo":   mk(keys[6], embed_dim, embed_dim),
    }


def tpa_forward(params, x, *, num_heads, q_rank, k_rank, v_rank,
                context_length, use_pallas=True):
    b, T, E = x.shape
    hd = E // num_heads

    aq = (x @ params["w_aq"]).reshape(b, T, num_heads, q_rank)
    ak = (x @ params["w_ak"]).reshape(b, T, num_heads, k_rank)
    av = (x @ params["w_av"]).reshape(b, T, num_heads, v_rank)
    bq = (x @ params["w_bq"]).reshape(b, T, q_rank, hd)
    bk = (x @ params["w_bk"]).reshape(b, T, k_rank, hd)
    bv = (x @ params["w_bv"]).reshape(b, T, v_rank, hd)

    cos, sin = make_rope_tables(hd, context_length)
    cos, sin = cos[:T], sin[:T]
    bq = apply_rope(bq, cos, sin)
    bk = apply_rope(bk, cos, sin)

    # Build q/k/v directly in (b, H, T, hd) so the kernel layout (B*H, T, hd)
    # is a free reshape (no separate transpose copies around the kernel).
    q = (jnp.einsum("bthr,btrd->bhtd", aq, bq) * (1.0 / q_rank)
         ).reshape(b * num_heads, T, hd)
    k = (jnp.einsum("bthr,btrd->bhtd", ak, bk) * (1.0 / k_rank)
         ).reshape(b * num_heads, T, hd)
    v = (jnp.einsum("bthr,btrd->bhtd", av, bv) * (1.0 / v_rank)
         ).reshape(b * num_heads, T, hd)

    sm_scale = 1.0 / math.sqrt(hd)   # F.scaled_dot_product_attention default

    if use_pallas:
        y = flash_causal_attention(q, k, v, sm_scale=sm_scale)
    else:
        # Pure-JAX reference (for correctness check only).
        s = jnp.einsum("bqd,bkd->bqk", q, k,
                       precision=jax.lax.Precision.HIGHEST) * sm_scale
        mask = jnp.tril(jnp.ones((T, T), dtype=bool))
        s = jnp.where(mask[None], s, -jnp.inf)
        p = jax.nn.softmax(s, axis=-1)
        y = jnp.einsum("bqk,bkd->bqd", p, v,
                       precision=jax.lax.Precision.HIGHEST)

    # Fold the head-transpose into the output projection:
    # (b,H,T,hd) x (H,hd,E) -> (b,T,E)  ==  y.transpose(0,2,1,3).reshape @ wo
    y = y.reshape(b, num_heads, T, hd)
    wo = params["wo"].reshape(num_heads, hd, E)
    return jnp.einsum("bhtd,hde->bte", y, wo)


if __name__ == "__main__":
    # Modest shapes, but sized so the kernel uses full 128x128 tiles and a
    # lane-dense head_dim of 128.
    batch = 2
    seq = 256
    embed_dim = 256
    num_heads = 2            # head_dim = 128
    context_length = 256
    q_rank = k_rank = v_rank = 2

    key = jax.random.PRNGKey(0)
    pkey, xkey = jax.random.split(key)
    params = init_tpa_params(pkey, embed_dim, num_heads, q_rank, k_rank, v_rank)
    x = jax.random.normal(xkey, (batch, seq, embed_dim), jnp.float32)

    fwd = functools.partial(tpa_forward, num_heads=num_heads, q_rank=q_rank,
                            k_rank=k_rank, v_rank=v_rank,
                            context_length=context_length)

    out = jax.block_until_ready(fwd(params, x, use_pallas=True))
    ref = jax.block_until_ready(fwd(params, x, use_pallas=False))

    assert out.shape == (batch, seq, embed_dim)
    assert jnp.allclose(out, ref, atol=1e-3, rtol=1e-3), \
        f"f32 path: max abs diff {jnp.max(jnp.abs(out - ref))}"

    # bf16 attention-only check (matmuls run in bf16, stats in f32) with a
    # relaxed tolerance.
    BH, T, hd = batch * num_heads, seq, embed_dim // num_heads
    kq, kk, kv = jax.random.split(jax.random.PRNGKey(1), 3)
    qb = jax.random.normal(kq, (BH, T, hd), jnp.bfloat16)
    kb = jax.random.normal(kk, (BH, T, hd), jnp.bfloat16)
    vb = jax.random.normal(kv, (BH, T, hd), jnp.bfloat16)
    smb = 1.0 / math.sqrt(hd)
    ob = jax.block_until_ready(
        flash_causal_attention(qb, kb, vb, sm_scale=smb))
    qf, kf, vf = (t.astype(jnp.float32) for t in (qb, kb, vb))
    sf = jnp.einsum("bqd,bkd->bqk", qf, kf,
                    precision=jax.lax.Precision.HIGHEST) * smb
    mask = jnp.tril(jnp.ones((T, T), dtype=bool))
    sf = jnp.where(mask[None], sf, -jnp.inf)
    of = jnp.einsum("bqk,bkd->bqd", jax.nn.softmax(sf, axis=-1), vf,
                    precision=jax.lax.Precision.HIGHEST)
    assert jnp.allclose(ob.astype(jnp.float32), of, atol=5e-2, rtol=5e-2), \
        f"bf16 path: max abs diff {jnp.max(jnp.abs(ob.astype(jnp.float32) - of))}"

    print("KERNEL_OK")
</pallas_src>

<mosaic_0001>
module attributes {stable_mosaic.version = 11 : i64} {
  func.func @_flash_causal_kernel(%arg0: i32, %arg1: i32, %arg2: i32, %arg3: memref<1x128x128xf32, #tpu.memory_space<vmem>>, %arg4: memref<1x128x128xf32, #tpu.memory_space<vmem>>, %arg5: memref<1x128x128xf32, #tpu.memory_space<vmem>>, %arg6: memref<1x128x128xf32, #tpu.memory_space<vmem>>, %arg7: memref<128x1xf32, #tpu.memory_space<vmem>>, %arg8: memref<128x1xf32, #tpu.memory_space<vmem>>, %arg9: memref<128x128xf32, #tpu.memory_space<vmem>>) attributes {dimension_semantics = [#tpu.dimension_semantics<parallel>, #tpu.dimension_semantics<parallel>, #tpu.dimension_semantics<arbitrary>], iteration_bounds = array<i64: 4, 2, 2>, scalar_prefetch = 0 : i64, scratch_operands = 3 : i64, tpu.core_type = #tpu.core_type<tc>, window_params = [{transform_indices = @transform_0, window_bounds = array<i64: 1, 128, 128>}, {transform_indices = @transform_1, window_bounds = array<i64: 1, 128, 128>}, {transform_indices = @transform_2, window_bounds = array<i64: 1, 128, 128>}, {transform_indices = @transform_3, window_bounds = array<i64: 1, 128, 128>}]} {
    %c0_i32 = arith.constant 0 : i32
    %0 = arith.cmpi eq, %arg2, %c0_i32 : i32
    %1 = arith.extui %0 : i1 to i32
    %c0_i32_0 = arith.constant 0 : i32
    %2 = arith.cmpi ne, %1, %c0_i32_0 : i32
    scf.if %2 {
      %cst = arith.constant -1.000000e+30 : f32
      %21 = vector.broadcast %cst : f32 to vector<128x1xf32>
      %c0 = arith.constant 0 : index
      %c0_10 = arith.constant 0 : index
      %22 = vector.load %arg7[%c0, %c0_10] : memref<128x1xf32, #tpu.memory_space<vmem>>, vector<128x1xf32>
      tpu.vector_store %arg7[%c0, %c0_10], %21 {strides = array<i32>} : memref<128x1xf32, #tpu.memory_space<vmem>>, vector<128x1xf32>,
      %cst_11 = arith.constant 0.000000e+00 : f32
      %23 = vector.broadcast %cst_11 : f32 to vector<128x1xf32>
      %c0_12 = arith.constant 0 : index
      %c0_13 = arith.constant 0 : index
      %24 = vector.load %arg8[%c0_12, %c0_13] : memref<128x1xf32, #tpu.memory_space<vmem>>, vector<128x1xf32>
      tpu.vector_store %arg8[%c0_12, %c0_13], %23 {strides = array<i32>} : memref<128x1xf32, #tpu.memory_space<vmem>>, vector<128x1xf32>,
      %cst_14 = arith.constant 0.000000e+00 : f32
      %25 = vector.broadcast %cst_14 : f32 to vector<128x128xf32>
      %c0_15 = arith.constant 0 : index
      %c0_16 = arith.constant 0 : index
      %26 = vector.load %arg9[%c0_15, %c0_16] : memref<128x128xf32, #tpu.memory_space<vmem>>, vector<128x128xf32>
      tpu.vector_store %arg9[%c0_15, %c0_16], %25 {strides = array<i32>} : memref<128x128xf32, #tpu.memory_space<vmem>>, vector<128x128xf32>,
    } else {
    }
    %c128_i32 = arith.constant 128 : i32
    %3 = arith.muli %arg2, %c128_i32 : i32
    %c1_i32 = arith.constant 1 : i32
    %4 = arith.addi %arg1, %c1_i32 : i32
    %c128_i32_1 = arith.constant 128 : i32
    %5 = arith.muli %4, %c128_i32_1 : i32
    %6 = arith.cmpi slt, %3, %5 : i32
    %c1_i32_2 = arith.constant 1 : i32
    %7 = arith.addi %arg2, %c1_i32_2 : i32
    %c128_i32_3 = arith.constant 128 : i32
    %8 = arith.muli %7, %c128_i32_3 : i32
    %c1_i32_4 = arith.constant 1 : i32
    %9 = arith.subi %8, %c1_i32_4 : i32
    %c128_i32_5 = arith.constant 128 : i32
    %10 = arith.muli %arg1, %c128_i32_5 : i32
    %11 = arith.cmpi sle, %9, %10 : i32
    %12 = arith.extui %11 : i1 to i32
    %c0_i32_6 = arith.constant 0 : i32
    %13 = arith.cmpi ne, %12, %c0_i32_6 : i32
    scf.if %13 {
      %c0 = arith.constant 0 : index
      %c0_10 = arith.constant 0 : index
      %c0_11 = arith.constant 0 : index
      %21 = vector.load %arg3[%c0, %c0_10, %c0_11] : memref<1x128x128xf32, #tpu.memory_space<vmem>>, vector<1x128x128xf32>
      %22 = vector.shape_cast %21 : vector<1x128x128xf32> to vector<128x128xf32>
      %c0_12 = arith.constant 0 : index
      %c0_13 = arith.constant 0 : index
      %c0_14 = arith.constant 0 : index
      %23 = vector.load %arg4[%c0_12, %c0_13, %c0_14] : memref<1x128x128xf32, #tpu.memory_space<vmem>>, vector<1x128x128xf32>
      %24 = vector.shape_cast %23 : vector<1x128x128xf32> to vector<128x128xf32>
      %c0_15 = arith.constant 0 : index
      %c0_16 = arith.constant 0 : index
      %c0_17 = arith.constant 0 : index
      %25 = vector.load %arg5[%c0_15, %c0_16, %c0_17] : memref<1x128x128xf32, #tpu.memory_space<vmem>>, vector<1x128x128xf32>
      %26 = vector.shape_cast %25 : vector<1x128x128xf32> to vector<128x128xf32>
      %cst = arith.constant dense<0.000000e+00> : vector<128x128xf32>
      %27 = tpu.matmul %22, %24, %cst {dimension_numbers = #tpu.dot_dimension_numbers<[1], [1], [0], [0], [0, 0, 1, 0], [], []>} : vector<128x128xf32>, vector<128x128xf32>, vector<128x128xf32> -> vector<128x128xf32>
      %cst_18 = arith.constant 0.0883883461 : f32
      %28 = vector.broadcast %cst_18 : f32 to vector<128x128xf32>
      %29 = arith.mulf %27, %28 : vector<128x128xf32>
      %c0_19 = arith.constant 0 : index
      %c0_20 = arith.constant 0 : index
      %30 = vector.load %arg7[%c0_19, %c0_20] : memref<128x1xf32, #tpu.memory_space<vmem>>, vector<128x1xf32>
      %cst_21 = arith.constant dense<0xFF800000> : vector<128xf32>
      %31 = vector.multi_reduction <maximumf>, %29, %cst_21 [1] : vector<128x128xf32> to vector<128xf32>
      %32 = vector.shape_cast %31 : vector<128xf32> to vector<128x1xf32>
      %33 = arith.maximumf %30, %32 : vector<128x1xf32>
      %34 = arith.subf %30, %33 : vector<128x1xf32>
      %35 = math.exp %34 : vector<128x1xf32>
      %36 = vector.broadcast %33 : vector<128x1xf32> to vector<128x128xf32>
      %37 = arith.subf %29, %36 : vector<128x128xf32>
      %38 = math.exp %37 : vector<128x128xf32>
      %c0_22 = arith.constant 0 : index
      %c0_23 = arith.constant 0 : index
      %39 = vector.load %arg8[%c0_22, %c0_23] : memref<128x1xf32, #tpu.memory_space<vmem>>, vector<128x1xf32>
      %40 = arith.mulf %35, %39 : vector<128x1xf32>
      %cst_24 = arith.constant dense<0.000000e+00> : vector<128xf32>
      %41 = vector.multi_reduction <add>, %38, %cst_24 [1] : vector<128x128xf32> to vector<128xf32>
      %42 = vector.shape_cast %41 : vector<128xf32> to vector<128x1xf32>
      %43 = arith.addf %40, %42 : vector<128x1xf32>
      %c0_25 = arith.constant 0 : index
      %c0_26 = arith.constant 0 : index
      %44 = vector.load %arg8[%c0_25, %c0_26] : memref<128x1xf32, #tpu.memory_space<vmem>>, vector<128x1xf32>
      tpu.vector_store %arg8[%c0_25, %c0_26], %43 {strides = array<i32>} : memref<128x1xf32, #tpu.memory_space<vmem>>, vector<128x1xf32>,
      %c0_27 = arith.constant 0 : index
      %c0_28 = arith.constant 0 : index
      %45 = vector.load %arg9[%c0_27, %c0_28] : memref<128x128xf32, #tpu.memory_space<vmem>>, vector<128x128xf32>
      %46 = vector.broadcast %35 : vector<128x1xf32> to vector<128x128xf32>
      %47 = arith.mulf %46, %45 : vector<128x128xf32>
      %cst_29 = arith.constant dense<0.000000e+00> : vector<128x128xf32>
      %48 = tpu.matmul %38, %26, %cst_29 {dimension_numbers = #tpu.dot_dimension_numbers<[1], [0], [0], [1], [0, 0, 1, 1], [], []>} : vector<128x128xf32>, vector<128x128xf32>, vector<128x128xf32> -> vector<128x128xf32>
      %49 = arith.addf %47, %48 : vector<128x128xf32>
      %c0_30 = arith.constant 0 : index
      %c0_31 = arith.constant 0 : index
      %50 = vector.load %arg9[%c0_30, %c0_31] : memref<128x128xf32, #tpu.memory_space<vmem>>, vector<128x128xf32>
      tpu.vector_store %arg9[%c0_30, %c0_31], %49 {strides = array<i32>} : memref<128x128xf32, #tpu.memory_space<vmem>>, vector<128x128xf32>,
      %c0_32 = arith.constant 0 : index
      %c0_33 = arith.constant 0 : index
      %51 = vector.load %arg7[%c0_32, %c0_33] : memref<128x1xf32, #tpu.memory_space<vmem>>, vector<128x1xf32>
      tpu.vector_store %arg7[%c0_32, %c0_33], %33 {strides = array<i32>} : memref<128x1xf32, #tpu.memory_space<vmem>>, vector<128x1xf32>,
    } else {
    }
    %true = arith.constant true
    %14 = arith.xori %11, %true : i1
    %15 = arith.andi %6, %14 : i1
    %16 = arith.extui %15 : i1 to i32
    %c0_i32_7 = arith.constant 0 : i32
    %17 = arith.cmpi ne, %16, %c0_i32_7 : i32
    scf.if %17 {
      %c0 = arith.constant 0 : index
      %c0_10 = arith.constant 0 : index
      %c0_11 = arith.constant 0 : index
      %21 = vector.load %arg3[%c0, %c0_10, %c0_11] : memref<1x128x128xf32, #tpu.memory_space<vmem>>, vector<1x128x128xf32>
      %22 = vector.shape_cast %21 : vector<1x128x128xf32> to vector<128x128xf32>
      %c0_12 = arith.constant 0 : index
      %c0_13 = arith.constant 0 : index
      %c0_14 = arith.constant 0 : index
      %23 = vector.load %arg4[%c0_12, %c0_13, %c0_14] : memref<1x128x128xf32, #tpu.memory_space<vmem>>, vector<1x128x128xf32>
      %24 = vector.shape_cast %23 : vector<1x128x128xf32> to vector<128x128xf32>
      %c0_15 = arith.constant 0 : index
      %c0_16 = arith.constant 0 : index
      %c0_17 = arith.constant 0 : index
      %25 = vector.load %arg5[%c0_15, %c0_16, %c0_17] : memref<1x128x128xf32, #tpu.memory_space<vmem>>, vector<1x128x128xf32>
      %26 = vector.shape_cast %25 : vector<1x128x128xf32> to vector<128x128xf32>
      %cst = arith.constant dense<0.000000e+00> : vector<128x128xf32>
      %27 = tpu.matmul %22, %24, %cst {dimension_numbers = #tpu.dot_dimension_numbers<[1], [1], [0], [0], [0, 0, 1, 0], [], []>} : vector<128x128xf32>, vector<128x128xf32>, vector<128x128xf32> -> vector<128x128xf32>
      %cst_18 = arith.constant 0.0883883461 : f32
      %28 = vector.broadcast %cst_18 : f32 to vector<128x128xf32>
      %29 = arith.mulf %27, %28 : vector<128x128xf32>
      %c128_i32_19 = arith.constant 128 : i32
      %30 = arith.muli %arg1, %c128_i32_19 : i32
      %31 = tpu.iota {dimensions = array<i32: 0>} : vector<128x128xi32>
      %32 = vector.broadcast %30 : i32 to vector<128x128xi32>
      %33 = arith.addi %32, %31 : vector<128x128xi32>
      %c128_i32_20 = arith.constant 128 : i32
      %34 = arith.muli %arg2, %c128_i32_20 : i32
      %35 = tpu.iota {dimensions = array<i32: 1>} : vector<128x128xi32>
      %36 = vector.broadcast %34 : i32 to vector<128x128xi32>
      %37 = arith.addi %36, %35 : vector<128x128xi32>
      %38 = arith.cmpi sle, %37, %33 : vector<128x128xi32>
      %cst_21 = arith.constant -1.000000e+30 : f32
      %39 = vector.broadcast %cst_21 : f32 to vector<128x128xf32>
      %40 = arith.select %38, %29, %39 : vector<128x128xi1>, vector<128x128xf32>
      %c0_22 = arith.constant 0 : index
      %c0_23 = arith.constant 0 : index
      %41 = vector.load %arg7[%c0_22, %c0_23] : memref<128x1xf32, #tpu.memory_space<vmem>>, vector<128x1xf32>
      %cst_24 = arith.constant dense<0xFF800000> : vector<128xf32>
      %42 = vector.multi_reduction <maximumf>, %40, %cst_24 [1] : vector<128x128xf32> to vector<128xf32>
      %43 = vector.shape_cast %42 : vector<128xf32> to vector<128x1xf32>
      %44 = arith.maximumf %41, %43 : vector<128x1xf32>
      %45 = arith.subf %41, %44 : vector<128x1xf32>
      %46 = math.exp %45 : vector<128x1xf32>
      %47 = vector.broadcast %44 : vector<128x1xf32> to vector<128x128xf32>
      %48 = arith.subf %40, %47 : vector<128x128xf32>
      %49 = math.exp %48 : vector<128x128xf32>
      %c0_25 = arith.constant 0 : index
      %c0_26 = arith.constant 0 : index
      %50 = vector.load %arg8[%c0_25, %c0_26] : memref<128x1xf32, #tpu.memory_space<vmem>>, vector<128x1xf32>
      %51 = arith.mulf %46, %50 : vector<128x1xf32>
      %cst_27 = arith.constant dense<0.000000e+00> : vector<128xf32>
      %52 = vector.multi_reduction <add>, %49, %cst_27 [1] : vector<128x128xf32> to vector<128xf32>
      %53 = vector.shape_cast %52 : vector<128xf32> to vector<128x1xf32>
      %54 = arith.addf %51, %53 : vector<128x1xf32>
      %c0_28 = arith.constant 0 : index
      %c0_29 = arith.constant 0 : index
      %55 = vector.load %arg8[%c0_28, %c0_29] : memref<128x1xf32, #tpu.memory_space<vmem>>, vector<128x1xf32>
      tpu.vector_store %arg8[%c0_28, %c0_29], %54 {strides = array<i32>} : memref<128x1xf32, #tpu.memory_space<vmem>>, vector<128x1xf32>,
      %c0_30 = arith.constant 0 : index
      %c0_31 = arith.constant 0 : index
      %56 = vector.load %arg9[%c0_30, %c0_31] : memref<128x128xf32, #tpu.memory_space<vmem>>, vector<128x128xf32>
      %57 = vector.broadcast %46 : vector<128x1xf32> to vector<128x128xf32>
      %58 = arith.mulf %57, %56 : vector<128x128xf32>
      %cst_32 = arith.constant dense<0.000000e+00> : vector<128x128xf32>
      %59 = tpu.matmul %49, %26, %cst_32 {dimension_numbers = #tpu.dot_dimension_numbers<[1], [0], [0], [1], [0, 0, 1, 1], [], []>} : vector<128x128xf32>, vector<128x128xf32>, vector<128x128xf32> -> vector<128x128xf32>
      %60 = arith.addf %58, %59 : vector<128x128xf32>
      %c0_33 = arith.constant 0 : index
      %c0_34 = arith.constant 0 : index
      %61 = vector.load %arg9[%c0_33, %c0_34] : memref<128x128xf32, #tpu.memory_space<vmem>>, vector<128x128xf32>
      tpu.vector_store %arg9[%c0_33, %c0_34], %60 {strides = array<i32>} : memref<128x128xf32, #tpu.memory_space<vmem>>, vector<128x128xf32>,
      %c0_35 = arith.constant 0 : index
      %c0_36 = arith.constant 0 : index
      %62 = vector.load %arg7[%c0_35, %c0_36] : memref<128x1xf32, #tpu.memory_space<vmem>>, vector<128x1xf32>
      tpu.vector_store %arg7[%c0_35, %c0_36], %44 {strides = array<i32>} : memref<128x1xf32, #tpu.memory_space<vmem>>, vector<128x1xf32>,
    } else {
    }
    %c1_i32_8 = arith.constant 1 : i32
    %18 = arith.cmpi eq, %arg2, %c1_i32_8 : i32
    %19 = arith.extui %18 : i1 to i32
    %c0_i32_9 = arith.constant 0 : i32
    %20 = arith.cmpi ne, %19, %c0_i32_9 : i32
    scf.if %20 {
      %c0 = arith.constant 0 : index
      %c0_10 = arith.constant 0 : index
      %21 = vector.load %arg8[%c0, %c0_10] : memref<128x1xf32, #tpu.memory_space<vmem>>, vector<128x1xf32>
      %22 = tpu.reciprocal %21 {approx = true} : vector<128x1xf32> -> vector<128x1xf32>
      %c0_11 = arith.constant 0 : index
      %c0_12 = arith.constant 0 : index
      %23 = vector.load %arg9[%c0_11, %c0_12] : memref<128x128xf32, #tpu.memory_space<vmem>>, vector<128x128xf32>
      %24 = vector.broadcast %22 : vector<128x1xf32> to vector<128x128xf32>
      %25 = arith.mulf %23, %24 : vector<128x128xf32>
      %c0_13 = arith.constant 0 : index
      %c0_14 = arith.constant 0 : index
      %c0_15 = arith.constant 0 : index
      %26 = vector.load %arg6[%c0_13, %c0_14, %c0_15] : memref<1x128x128xf32, #tpu.memory_space<vmem>>, vector<1x128x128xf32>
      %27 = vector.shape_cast %26 : vector<1x128x128xf32> to vector<128x128xf32>
      %28 = vector.shape_cast %25 : vector<128x128xf32> to vector<1x128x128xf32>
      tpu.vector_store %arg6[%c0_13, %c0_14, %c0_15], %28 {strides = array<i32>} : memref<1x128x128xf32, #tpu.memory_space<vmem>>, vector<1x128x128xf32>,
    } else {
    }
    return
  }
  func.func @transform_0(%arg0: i32, %arg1: i32, %arg2: i32) -> (i32, i32, i32) {
    %c0_i32 = arith.constant 0 : i32
    %c0_i32_0 = arith.constant 0 : i32
    return %arg0, %arg1, %c0_i32 : i32, i32, i32
  }
  func.func @transform_1(%arg0: i32, %arg1: i32, %arg2: i32) -> (i32, i32, i32) {
    %0 = arith.minsi %arg2, %arg1 : i32
    %c0_i32 = arith.constant 0 : i32
    %c0_i32_0 = arith.constant 0 : i32
    return %arg0, %0, %c0_i32 : i32, i32, i32
  }
  func.func @transform_2(%arg0: i32, %arg1: i32, %arg2: i32) -> (i32, i32, i32) {
    %0 = arith.minsi %arg2, %arg1 : i32
    %c0_i32 = arith.constant 0 : i32
    %c0_i32_0 = arith.constant 0 : i32
    return %arg0, %0, %c0_i32 : i32, i32, i32
  }
  func.func @transform_3(%arg0: i32, %arg1: i32, %arg2: i32) -> (i32, i32, i32) {
    %c0_i32 = arith.constant 0 : i32
    %c0_i32_0 = arith.constant 0 : i32
    return %arg0, %arg1, %c0_i32 : i32, i32, i32
  }
}

</mosaic_0001>

<bundles_post_ra>
// kernel: tpu_custom_call.1
= control target key start
LH: loop header
LB: loop body
LE: loop exit
PB: predicated region body
PF: predicated region fallthrough
CT: control target
= control target key end

     0   :  { %s4649_s0 = inlined_call_operand.hbm [shape: f32[4,256,128], index: 0, kind: input, shape index: {}]   ;;  %s4650_s1 = inlined_call_operand.hbm [shape: f32[4,256,128], index: 1, kind: input, shape index: {}]   ;;  %s4651_s2 = inlined_call_operand.hbm [shape: f32[4,256,128], index: 2, kind: input, shape index: {}]   ;;  %s4652_s3 = inlined_call_operand.hbm [shape: f32[4,256,128], index: 3, kind: output, shape index: {}]  }
   0x1   :  { %4667 = sst [smem:[#allocation25_spill]] %s4650_s1 }
   0x2   :  { %4668 = sst [smem:[#allocation26_spill]] %s4651_s2 }
   0x3   :  { %4669 = sst [smem:[#allocation27_spill]] %s4652_s3 }
   0x4   :  { %8 = vsyncpa [#allocation6], 0 }
   0x5   :  { %10 = vsyncpa [#allocation6 + $0x1], 0 }
   0x6   :  { %11 = vsyncpa [#allocation9], 0 }
   0x7   :  { %13 = vsyncpa [#allocation9 + $0x1], 0 }
   0x8   :  { %14 = vsyncpa [#allocation7], 0 }
   0x9   :  { %16 = vsyncpa [#allocation7 + $0x1], 0  ;;  %s3439_s12 = smov 0   ;;  %s3441_s13 = smov 0  }
   0xa   :  { %s3443_s14 = smov 0   ;;  %s3445_s15 = smov 0  }
   0xb   :  { %s3447_s16 = smov 0   ;;  %s3449_s17 = smov 0  }
   0xc   :  { %s3451_s18 = smov 0   ;;  %s3453_s19 = smov 0  }
   0xd   :  { %s3455_s20 = smov 0   ;;  %s3457_s21 = smov 0  }
   0xe   :  { %s3459_s22 = smov 0   ;;  %s3461_s23 = smov 0  }
   0xf   :  { %s3463_s24 = smov 0  }
  0x10 LB: > { %4670 = sst [smem:[#allocation15_spill]] %s3364_s14  ;;  %s34_s25 = sadd.s32 1, %s3392_s21  ;;  %s3404_s24 = sphi %s3463_s24, %s22_s24   ;;  %s3400_s23 = sphi %s3461_s23, %s4716_s23   ;;  %s3396_s22 = sphi %s3459_s22, %s4708_s22   ;;  %s3392_s21 = sphi %s3457_s21, %s4707_s21   ;;  %s3388_s20 = sphi %s3455_s20, %s4715_s20   ;;  %s3384_s19 = sphi %s3453_s19, %s4706_s19   ;;  %s3380_s18 = sphi %s3451_s18, %s4705_s18   ;;  %s3376_s17 = sphi %s3449_s17, %s4714_s17   ;;  %s3372_s16 = sphi %s3447_s16, %s4713_s16   ;;  %s3368_s15 = sphi %s3445_s15, %s4712_s15   ;;  %s3364_s14 = sphi %s3443_s14, %s4703_s14   ;;  %s3360_s13 = sphi %s3441_s13, %s4711_s13   ;;  %s3356_s12 = sphi %s3439_s12, %s4710_s12  }
  0x11   : > { %4671 = sst [smem:[#allocation16_spill]] %s3384_s19  ;;  %p35_p0 = scmp.ge.s32.totalorder %s34_s25, 2 }
  0x12   : > { %4672 = sst [smem:[#allocation17_spill]] %s3388_s20  ;;  %s37_s26 = sadd.s32 1, %s3396_s22 }
  0x13   : > { %4673 = sst [smem:[#allocation18_spill]] %s3392_s21  ;;  %s3507_s27 = sadd.s32 4294967295, %s3404_s24  }
  0x14   : > { %4674 = sst [smem:[#allocation19_spill]] %s3396_s22  ;;  %s41_s28 = sadd.s32 1, %s3400_s23 }
  0x15   : > { %s4718_s25 = smov (%p35_p0, %s34_s25), 0  ;;  %s4720_s26 = smov (!%p35_p0, %s37_s26), %s3396_s22 }
  0x16   : > { %4675 = sst [smem:[#allocation20_spill]] %s4718_s25  ;;  %p58_p1 = scmp.eq.s32.totalorder %s3404_s24, 0 }
  0x17   : > { %p73_p2 = scmp.lt.s32.totalorder %s3392_s21, %s3396_s22  ;;  %p39_p3 = scmp.ge.s32.totalorder %s4720_s26, 2 }
  0x18   : > { %p64_p4 = scmp.eq.s32.totalorder %s3507_s27, 0  ;;  %s82_s30 = sadd.s32 1, %s3364_s14 }
  0x19   : > { %s74_s29 = scalar_select %p73_p2, %s3392_s21, %s3396_s22 }
  0x1a   : > { %s4722_s26 = smov (%p39_p3, %s4720_s26), 0  ;;  %s4724_s28 = smov (!%p39_p3, %s41_s28), %s3400_s23 }
  0x1b   : > { %4676 = sst [smem:[#allocation21_spill]] %s4722_s26  ;;  %p75_p5 = scmp.lt.s32.totalorder %s4718_s25, %s4722_s26 }
  0x1c   : > { %p43_p6 = scmp.ge.s32.totalorder %s4724_s28, 4  ;;  %p89_p7 = scmp.ne.s32.totalorder %s3364_s14, %s3360_s13 }
  0x1d   : > { %s76_s4 = scalar_select %p75_p5, %s4718_s25, %s4722_s26 }
  0x1e   : > { %s4726_s28 = smov (%p43_p6, %s4724_s28), 0  ;;  %s46_s5 = ssub.s32 %s3396_s22, %s4722_s26 }
  0x1f   : > { %4677 = sst [smem:[#allocation22_spill]] %s4726_s28  ;;  %s78_s6 = ssub.s32 %s74_s29, %s76_s4 }
  0x20   : > { %s45_s7 = ssub.s32 %s3400_s23, %s4726_s28  ;;  %p95_p8 = scmp.ne.s32.totalorder %s3360_s13, %s3356_s12 }
  0x21   : > { %s79_s8 = sor.u32 %s78_s6, %s45_s7  ;;  %p3539_p9 = por %p89_p7, %p58_p1 }
  0x22   : > { %s3543_s10 = sor.u32 %s46_s5, %s45_s7  ;;  %p80_p10 = scmp.eq.s32.totalorder %s79_s8, 0 }
  0x23   : > { %p3547_p11 = por %p95_p8, %p64_p4  ;;  %p2899_p12 = scmp.lt.s32.totalorder %s3404_s24, 16 }
  0x24   : > { %s3552_s4 = scalar_select %p80_p10, %s3364_s14, %s82_s30  }
  0x25   : > { %s4679_s11 = scalar_select %p3547_p11, 1, 0 }
  0x26   : > { %4680 = sst [smem:[#allocation23_spill]] %s3552_s4  ;;  %s2492_s12 = sshll.u32 %s3400_s23, 5 }
  0x27   : > { %s202_s6 = sand.u32 1, %s3404_s24   ;;  %s204_s28 = sand.u32 1, %s3364_s14  }
  0x28   : > { %s3558_s26 = sshll.u32 %s204_s28, 7  ;;  %s2495_s5 = sshll.u32 %s74_s29, 4 }
  0x29   : > { %s214_s7 = sadd.s32 %s2495_s5, %s2492_s12  ;;  %s206_s25 = scalar_lea.vmem [#allocation8], %s3558_s26 }
  0x2a   : > { %s217_s8 = sshll.u32 %s206_s25, 4  ;;  %s2497_s21 = sshll.u32 %s214_s7, 7  ;;  %s218_s8 = int_to_ptr.vmem [resolvable:$true] %s217_s8 }
  0x2b   : > { %s4681_s1 = sld [smem:[#allocation25_spill]]  ;;  %p3570_p13 = pnand %p2899_p12, %p3539_p9 }
  0x2c   : > { %p48_p0 = scmp.eq.s32.totalorder %s3543_s10, 0  ;;  %s4683_s2 = sld [smem:[#allocation26_spill]] }
  0x2d   : > { %s3580_s25 = scalar_lea.sflag [#allocation9], %s202_s6  ;;  %p4658_p2 = pneg %p3570_p13 }
  0x2e   : > { %s3193_s3 = scalar_lea.vmem %s218_s8, 2048  ;;  %s3406_s20 = smov [#allocation8]  }
  0x2f   : > { %p3194_p3 = scmp.ne.s32.totalorder %s218_s8, %s3193_s3  ;;  %s3198_s9 = sshll.u32 %s3406_s20, 4  ;;  %s3199_s9 = int_to_ptr.vmem [resolvable:$false] %s3198_s9 }
  0x30   : > { %s3200_s7 = scalar_lea.vmem %s3199_s9, 4096  ;;  %p3201_p7 = scmp.lt.s32.totalorder %s218_s8, %s3199_s9 }
  0x31   : > { %s216_s19 = scalar_lea.hbm %s4681_s1, %s2497_s21  ;;  %p3196_p5 = pnand %p3194_p3, %p4658_p2 }
  0x32   : > { %s3578_s5 = scalar_lea.hbm %s4683_s2, %s2497_s21  ;;  %p3202_p8 = scmp.lt.s32.totalorder %s3200_s7, %s3193_s3 }
  0x33   : > { %p3197_p6 = pneg %p3196_p5 }
  0x34   : > { %p3203_p9 = por %p3202_p8, %p3201_p7 }
  0x36   : > { %p3204_p10 = pnand %p3203_p9, %p3197_p6 }
  0x38   : > { %3207 = shalt.err (!%p3204_p10)
}
  0x39   : > { %s4659_s21 = smov 128   ;;  %s4661_s6 = smov 8  }
  0x3a   : > { %2891 = dma.hbm_to_vmem [thread:$0]  (!%p3570_p13), %s216_s19, 2048, %s218_s8, %s3580_s25, %s4659_s21, %s4659_s21, %s4661_s6  }
  0x3b   : > { %s231_s28 = scalar_lea.vmem [#allocation10], %s3558_s26  ;;  %p2502_p3 = scmp.ge.s32.totalorder %s3404_s24, 1 }
  0x3c   : > { %s242_s29 = sshll.u32 %s231_s28, 4  ;;  %p250_p5 = scmp.lt.s32.totalorder %s3404_s24, 17  ;;  %s3612_s29 = int_to_ptr.vmem [resolvable:$true] %s242_s29 }
  0x3d   : > { %s2487_s20 = sadd.s32 4294967294, %s3404_s24   ;;  %s50_s9 = sadd.s32 1, %s3376_s17 }
  0x3e   : > { %p3596_p6 = pnand %p2502_p3, %p250_p5  ;;  %p57_p7 = scmp.ne.s32.totalorder %s3376_s17, %s3372_s16 }
  0x3f   : > { %s3605_s7 = scalar_select %p48_p0, %s3376_s17, %s50_s9  }
  0x40   : > { %p63_p8 = scmp.ne.s32.totalorder %s3372_s16, %s3368_s15  ;;  %p153_p9 = scmp.eq.s32.totalorder %s3507_s27, 15 }
  0x41   : > { %4685 = sst [smem:[#allocation24_spill]] %s3605_s7  ;;  %p159_p10 = scmp.eq.s32.totalorder %s2487_s20, 15 }
  0x42   : > { %p3616_p3 = por %p64_p4, %p63_p8  ;;  %p3620_p5 = por %p153_p9, %p57_p7 }
  0x43   : > { %p3624_p0 = por %p159_p10, %p63_p8  ;;  %s179_s8 = sand.u32 1, %s3376_s17  }
  0x44   : > { %s4687_s26 = scalar_select %p3620_p5, 1, 0 }
  0x45   : > { %s4688_s10 = scalar_select %p3624_p0, 1, 0 }
  0x46   : > { %s2491_s28 = sshll.u32 %s3396_s22, 4  ;;  %p59_p2 = por %p58_p1, %p57_p7 }
  0x47   : > { %s2490_s20 = sshll.u32 %s179_s8, 7  ;;  %s189_s9 = sadd.s32 %s2492_s12, %s2491_s28 }
  0x48   : > { %s2493_s21 = sshll.u32 %s189_s9, 7  ;;  %s183_s6 = scalar_lea.vmem [#allocation5], %s2490_s20 }
  0x49   : > { %s192_s1 = sshll.u32 %s183_s6, 4  ;;  %s3639_s4 = scalar_lea.hbm %s4649_s0, %s2493_s21  ;;  %s3641_s1 = int_to_ptr.vmem [resolvable:$true] %s192_s1 }
  0x4a   : > { %p3645_p4 = pnand %p2899_p12, %p59_p2  ;;  %s3221_s14 = scalar_lea.vmem %s3612_s29, 2048 }
  0x4b   : > { %p3222_p1 = scmp.ne.s32.totalorder %s3612_s29, %s3221_s14  ;;  %p4690_p7 = pneg %p3570_p13 }
  0x4c   : > { %s3409_s12 = smov [#allocation10]  }
  0x4d   : > { %p3224_p8 = pnand %p3222_p1, %p4690_p7  ;;  %s3226_s6 = sshll.u32 %s3409_s12, 4  ;;  %s3227_s6 = int_to_ptr.vmem [resolvable:$false] %s3226_s6 }
  0x4e   : > { %s3228_s28 = scalar_lea.vmem %s3227_s6, 4096  ;;  %p3229_p10 = scmp.lt.s32.totalorder %s3612_s29, %s3227_s6 }
  0x4f   : > { %p3225_p9 = pneg %p3224_p8  ;;  %p3230_p0 = scmp.lt.s32.totalorder %s3228_s28, %s3221_s14 }
  0x51   : > { %p3231_p5 = por %p3230_p0, %p3229_p10 }
  0x53   : > { %p3232_p11 = pnand %p3231_p5, %p3225_p9 }
  0x55   : > { %3235 = shalt.err (!%p3232_p11)
}
  0x56   : > { %s4691_s2 = smov 8   ;;  %s4692_s21 = smov 128  }
  0x57   : > { %2894 = dma.hbm_to_vmem [thread:$0]  (!%p3570_p13), %s3578_s5, 2048, %s3612_s29, %s3580_s25, %s4692_s21, %s4692_s21, %s4691_s2  }
  0x58   : > { %s180_s7 = scalar_lea.sflag [#allocation6], %s179_s8  ;;  %p3238_p12 = pneg %p3645_p4 }
  0x59   : > { %s3249_s14 = scalar_lea.vmem %s3641_s1, 2048  ;;  %s3410_s30 = smov [#allocation5]  }
  0x5a   : > { %p3250_p11 = scmp.ne.s32.totalorder %s3641_s1, %s3249_s14  ;;  %s3254_s20 = sshll.u32 %s3410_s30, 4  ;;  %s3255_s20 = int_to_ptr.vmem [resolvable:$false] %s3254_s20 }
  0x5b   : > { %s3256_s9 = scalar_lea.vmem %s3255_s20, 4096  ;;  %p3257_p0 = scmp.lt.s32.totalorder %s3641_s1, %s3255_s20 }
  0x5c   : > { %p3252_p2 = pnand %p3250_p11, %p3238_p12  ;;  %p3258_p1 = scmp.lt.s32.totalorder %s3256_s9, %s3249_s14 }
  0x5e   : > { %p3253_p5 = pneg %p3252_p2  ;;  %p3259_p7 = por %p3258_p1, %p3257_p0 }
  0x60   : > { %p3260_p8 = pnand %p3259_p7, %p3253_p5 }
  0x62   : > { %3263 = shalt.err (!%p3260_p8)
}
  0x63   : > { %2888 = dma.hbm_to_vmem [thread:$0]  (!%p3645_p4), %s3639_s4, 2048, %s3641_s1, %s180_s7, %s4692_s21, %s4692_s21, %s4691_s2  }
  0x64   : > { %254 = sbr.rel (%p3596_p6) target bundleno = 1946 (0x79a), region = 32  ;;  %s3680_s5 = sand.u32 (!%p3596_p6), 1, %s3372_s16  }
  0x65   : > { %s2503_s25 = sshll.u32 (!%p3596_p6), %s3680_s5, 7  ;;  %s257_s29 = scalar_lea.sflag (!%p3596_p6), [#allocation6], %s3680_s5 }
  0x66   : > { %s3684_s8 = scalar_lea.vmem (!%p3596_p6), [#allocation5], %s2503_s25 }
  0x69   : > { %3343 = dma.done.wait (%p3616_p3), %s257_s29, 2048  }
  0x6a   : > { %3345 = vsyncadd (%p3616_p3), %s257_s29, 4294965248  ;;  %s265_s1 = sand.u32 1, %s3507_s27   ;;  %s267_s22 = sand.u32 1, %s3360_s13  }
  0x6b   : > { %s2504_s4 = sshll.u32 %s267_s22, 7  ;;  %s266_s3 = scalar_lea.sflag [#allocation9], %s265_s1 }
  0x6c   : > { %s3692_s12 = scalar_lea.vmem [#allocation8], %s2504_s4  ;;  %p4693_p13 = scmp.ne.s32.totalorder %s4679_s11, 0 }
  0x6e   : > { %3347 = dma.done.wait (%p4693_p13), %s266_s3, 4096  }
  0x6f   : > { %3349 = vsyncadd (%p4693_p13), %s266_s3, 4294963200  ;;  %s3698_s6 = scalar_lea.vmem [#allocation10], %s2504_s4  ;;  %s3700_s28 = scalar_lea.vmem [#allocation11], %s2503_s25 }
  0x70   : > { %p2507_p6 = scmp.ne.s32.totalorder %s3380_s18, 0 }
  0x72   : > { %322 = sbr.rel (%p2507_p6) target bundleno = 144 (0x90), region = 48 }
  0x77   : > { %vm323_vm0 = vcmask 7168   ;;  %v3411_v0 = vmov -1e+30   ;;  %v3412_v1 = vmov 0.0  }
  0x78   : > { %324 = vst.msk [vmem:[#allocation2] sm:$0xff] %vm323_vm0, %v3411_v0  ;;  %325 = vst.msk [vmem:[#allocation2 + $0x8] sm:$0xff] %vm323_vm0, %v3411_v0 }
  0x79   : > { %326 = vst.msk [vmem:[#allocation2 + $0x10] sm:$0xff] %vm323_vm0, %v3411_v0  ;;  %327 = vst.msk [vmem:[#allocation2 + $0x18] sm:$0xff] %vm323_vm0, %v3411_v0 }
  0x7a   : > { %328 = vst.msk [vmem:[#allocation2 + $0x20] sm:$0xff] %vm323_vm0, %v3411_v0  ;;  %329 = vst.msk [vmem:[#allocation2 + $0x28] sm:$0xff] %vm323_vm0, %v3411_v0 }
  0x7b   : > { %330 = vst.msk [vmem:[#allocation2 + $0x30] sm:$0xff] %vm323_vm0, %v3411_v0  ;;  %331 = vst.msk [vmem:[#allocation2 + $0x38] sm:$0xff] %vm323_vm0, %v3411_v0 }
  0x7c   : > { %332 = vst.msk [vmem:[#allocation2 + $0x40] sm:$0xff] %vm323_vm0, %v3411_v0  ;;  %333 = vst.msk [vmem:[#allocation2 + $0x48] sm:$0xff] %vm323_vm0, %v3411_v0 }
  0x7d   : > { %334 = vst.msk [vmem:[#allocation2 + $0x50] sm:$0xff] %vm323_vm0, %v3411_v0  ;;  %335 = vst.msk [vmem:[#allocation2 + $0x58] sm:$0xff] %vm323_vm0, %v3411_v0 }
  0x7e   : > { %336 = vst.msk [vmem:[#allocation2 + $0x60] sm:$0xff] %vm323_vm0, %v3411_v0  ;;  %337 = vst.msk [vmem:[#allocation2 + $0x68] sm:$0xff] %vm323_vm0, %v3411_v0 }
  0x7f   : > { %338 = vst.msk [vmem:[#allocation2 + $0x70] sm:$0xff] %vm323_vm0, %v3411_v0  ;;  %339 = vst.msk [vmem:[#allocation2 + $0x78] sm:$0xff] %vm323_vm0, %v3411_v0 }
  0x80   : > { %340 = vst.msk [vmem:[#allocation3] sm:$0xff] %vm323_vm0, %v3412_v1  ;;  %341 = vst.msk [vmem:[#allocation3 + $0x8] sm:$0xff] %vm323_vm0, %v3412_v1 }
  0x81   : > { %342 = vst.msk [vmem:[#allocation3 + $0x10] sm:$0xff] %vm323_vm0, %v3412_v1  ;;  %343 = vst.msk [vmem:[#allocation3 + $0x18] sm:$0xff] %vm323_vm0, %v3412_v1 }
  0x82   : > { %344 = vst.msk [vmem:[#allocation3 + $0x20] sm:$0xff] %vm323_vm0, %v3412_v1  ;;  %345 = vst.msk [vmem:[#allocation3 + $0x28] sm:$0xff] %vm323_vm0, %v3412_v1 }
  0x83   : > { %346 = vst.msk [vmem:[#allocation3 + $0x30] sm:$0xff] %vm323_vm0, %v3412_v1  ;;  %347 = vst.msk [vmem:[#allocation3 + $0x38] sm:$0xff] %vm323_vm0, %v3412_v1 }
  0x84   : > { %348 = vst.msk [vmem:[#allocation3 + $0x40] sm:$0xff] %vm323_vm0, %v3412_v1  ;;  %349 = vst.msk [vmem:[#allocation3 + $0x48] sm:$0xff] %vm323_vm0, %v3412_v1 }
  0x85   : > { %350 = vst.msk [vmem:[#allocation3 + $0x50] sm:$0xff] %vm323_vm0, %v3412_v1  ;;  %351 = vst.msk [vmem:[#allocation3 + $0x58] sm:$0xff] %vm323_vm0, %v3412_v1 }
  0x86   : > { %352 = vst.msk [vmem:[#allocation3 + $0x60] sm:$0xff] %vm323_vm0, %v3412_v1  ;;  %353 = vst.msk [vmem:[#allocation3 + $0x68] sm:$0xff] %vm323_vm0, %v3412_v1 }
  0x87   : > { %354 = vst.msk [vmem:[#allocation3 + $0x70] sm:$0xff] %vm323_vm0, %v3412_v1  ;;  %355 = vst.msk [vmem:[#allocation3 + $0x78] sm:$0xff] %vm323_vm0, %v3412_v1 }
  0x88   : > { %356 = vst [vmem:[#allocation4 + $0x30] sm:$0xff] %v3412_v1  ;;  %357 = vst [vmem:[#allocation4] sm:$0xff] %v3412_v1 }
  0x89   : > { %358 = vst [vmem:[#allocation4 + $0x58] sm:$0xff] %v3412_v1  ;;  %359 = vst [vmem:[#allocation4 + $0x18] sm:$0xff] %v3412_v1 }
  0x8a   : > { %360 = vst [vmem:[#allocation4 + $0x50] sm:$0xff] %v3412_v1  ;;  %361 = vst [vmem:[#allocation4 + $0x68] sm:$0xff] %v3412_v1 }
  0x8b   : > { %362 = vst [vmem:[#allocation4 + $0x8] sm:$0xff] %v3412_v1  ;;  %363 = vst [vmem:[#allocation4 + $0x48] sm:$0xff] %v3412_v1 }
  0x8c   : > { %364 = vst [vmem:[#allocation4 + $0x40] sm:$0xff] %v3412_v1  ;;  %365 = vst [vmem:[#allocation4 + $0x20] sm:$0xff] %v3412_v1 }
  0x8d   : > { %366 = vst [vmem:[#allocation4 + $0x10] sm:$0xff] %v3412_v1  ;;  %367 = vst [vmem:[#allocation4 + $0x38] sm:$0xff] %v3412_v1 }
  0x8e   : > { %368 = vst [vmem:[#allocation4 + $0x60] sm:$0xff] %v3412_v1  ;;  %369 = vst [vmem:[#allocation4 + $0x70] sm:$0xff] %v3412_v1 }
  0x8f   : > { %370 = vst [vmem:[#allocation4 + $0x78] sm:$0xff] %v3412_v1  ;;  %371 = vst [vmem:[#allocation4 + $0x28] sm:$0xff] %v3412_v1 }
  0x90 PF: > { %s4694_s27 = sld [smem:[#allocation16_spill]]  ;;  %s3736_s11 = sshll.u32 %s3380_s18, 7 }
  0x91   : > { %s2524_s21 = sadd.s32 128, %s3736_s11 }
  0x92   : > { %s3748_s14 = sadd.s32 4294967295, %s2524_s21 }
  0x96   : > { %s3739_s19 = sshll.u32 %s4694_s27, 7 }
  0x97   : > { %s2522_s2 = sadd.s32 128, %s3739_s19  ;;  %p2513_p4 = scmp.gt.s32.totalorder %s3748_s14, %s3739_s19 }
  0x98   : > { %p3744_p3 = scmp.lt.s32.totalorder %s3736_s11, %s2522_s2 }
  0x99   : > { %383 = sbr.rel (%p2513_p4) target bundleno = 945 (0x3b1), region = 52 }
  0x9e   : > { %v415_v2 = vld [vmem:[%s3692_s12 + $0x78] sm:$0xff]  ;;  %v414_v3 = vld [vmem:[%s3692_s12 + $0x70] sm:$0xff]  ;;  %v413_v4 = vld [vmem:[%s3692_s12 + $0x68] sm:$0xff]  ;;  %v3413_v51 = vmov 0   ;;  %vm913_vm1 = vcmask 7168  }
  0x9f   : > { %2653 = vmatprep.subr.mxu0 %v415_v2  ;;  %v384_v5 = vld [vmem:[%s3684_s8] sm:$0xff]  ;;  %v411_v7 = vld [vmem:[%s3692_s12 + $0x58] sm:$0xff]  ;;  %v410_v8 = vld [vmem:[%s3692_s12 + $0x50] sm:$0xff]  ;;  %3014 = vset.pattern.permute.xlu0 %v3413_v51 }
  0xa0   : > { %2654 = vmatpush3.xpose.msra.mxu0 %v415_v2  ;;  %2685 = vmatprep.mubr.f32.mxu0 %v384_v5  ;;  %v412_v6 = vld [vmem:[%s3692_s12 + $0x60] sm:$0xff]  ;;  %v409_v9 = vld [vmem:[%s3692_s12 + $0x48] sm:$0xff]  ;;  %v407_v11 = vld [vmem:[%s3692_s12 + $0x38] sm:$0xff] }
  0xa1   : > { %2655 = vmatprep.subr.mxu0 %v414_v3  ;;  %v408_v10 = vld [vmem:[%s3692_s12 + $0x40] sm:$0xff]  ;;  %v406_v12 = vld [vmem:[%s3692_s12 + $0x30] sm:$0xff]  ;;  %v405_v13 = vld [vmem:[%s3692_s12 + $0x28] sm:$0xff]  ;;  %3015 = vset.pattern.permute.xlu1 %v3413_v51 }
  0xa2   : > { %v404_v14 = vld [vmem:[%s3692_s12 + $0x20] sm:$0xff]  ;;  %v403_v15 = vld [vmem:[%s3692_s12 + $0x18] sm:$0xff]  ;;  %v402_v16 = vld [vmem:[%s3692_s12 + $0x10] sm:$0xff] }
  0xa3   : > { %v401_v17 = vld [vmem:[%s3692_s12 + $0x8] sm:$0xff]  ;;  %v400_v18 = vld [vmem:[%s3692_s12] sm:$0xff]  ;;  %v386_v20 = vld [vmem:[%s3684_s8 + $0x10] sm:$0xff] }
  0xa4   : > { %2656 = vmatpush3.xpose.msra.mxu0 %v414_v3  ;;  %v385_v19 = vld [vmem:[%s3684_s8 + $0x8] sm:$0xff]  ;;  %v387_v21 = vld [vmem:[%s3684_s8 + $0x18] sm:$0xff]  ;;  %v388_v22 = vld [vmem:[%s3684_s8 + $0x20] sm:$0xff] }
  0xa5   : > { %2657 = vmatprep.subr.mxu0 %v413_v4  ;;  %v389_v23 = vld [vmem:[%s3684_s8 + $0x28] sm:$0xff]  ;;  %v390_v24 = vld [vmem:[%s3684_s8 + $0x30] sm:$0xff]  ;;  %v391_v25 = vld [vmem:[%s3684_s8 + $0x38] sm:$0xff] }
  0xa6   : > { %v392_v26 = vld [vmem:[%s3684_s8 + $0x40] sm:$0xff]  ;;  %v393_v27 = vld [vmem:[%s3684_s8 + $0x48] sm:$0xff]  ;;  %v394_v28 = vld [vmem:[%s3684_s8 + $0x50] sm:$0xff] }
  0xa7   : > { %v395_v29 = vld [vmem:[%s3684_s8 + $0x58] sm:$0xff]  ;;  %v396_v30 = vld [vmem:[%s3684_s8 + $0x60] sm:$0xff]  ;;  %v397_v31 = vld [vmem:[%s3684_s8 + $0x68] sm:$0xff] }
  0xa8   : > { %2658 = vmatpush3.xpose.msra.mxu0 %v413_v4  ;;  %v398_v32 = vld [vmem:[%s3684_s8 + $0x70] sm:$0xff]  ;;  %v399_v33 = vld [vmem:[%s3684_s8 + $0x78] sm:$0xff]  ;;  %v429_v5 = vld [vmem:[%s3698_s6 + $0x68] sm:$0xff] }
  0xa9   : > { %2659 = vmatprep.subr.mxu0 %v412_v6  ;;  %v431_v3 = vld [vmem:[%s3698_s6 + $0x78] sm:$0xff]  ;;  %v430_v4 = vld [vmem:[%s3698_s6 + $0x70] sm:$0xff]  ;;  %v3906_v51 = vld [vmem:[#allocation2 + $0x48] sm:$0xff] }
  0xaa   : > { %2709 = vmatprep.subr.mxu1 %v431_v3 }
  0xab   : > { %2710 = vmatpush3.msra.mxu1 %v431_v3 }
  0xac   : > { %2660 = vmatpush3.xpose.msra.mxu0 %v412_v6  ;;  %2711 = vmatprep.subr.mxu1 %v430_v4  ;;  %v428_v6 = vld [vmem:[%s3698_s6 + $0x60] sm:$0xff] }
  0xad   : > { %2661 = vmatprep.subr.mxu0 %v411_v7  ;;  %2712 = vmatpush3.msra.mxu1 %v430_v4 }
  0xae   : > { %2713 = vmatprep.subr.mxu1 %v429_v5 }
  0xaf   : > { %2714 = vmatpush3.msra.mxu1 %v429_v5  ;;  %v604_v5 = vld [vmem:[#allocation2 + $0x58] sm:$0xff] }
  0xb0   : > { %2662 = vmatpush3.xpose.msra.mxu0 %v411_v7  ;;  %v427_v7 = vld [vmem:[%s3698_s6 + $0x58] sm:$0xff]  ;;  %2715 = vmatprep.subr.mxu1 %v428_v6 }
  0xb1   : > { %2663 = vmatprep.subr.mxu0 %v410_v8  ;;  %2716 = vmatpush3.msra.mxu1 %v428_v6 }
  0xb2   : > { %2717 = vmatprep.subr.mxu1 %v427_v7 }
  0xb3   : > { %2718 = vmatpush3.msra.mxu1 %v427_v7 }
  0xb4   : > { %2664 = vmatpush3.xpose.msra.mxu0 %v410_v8  ;;  %v3840_v8 = vld [vmem:[#allocation2] sm:$0xff] }
  0xb5   : > { %2665 = vmatprep.subr.mxu0 %v409_v9 }
  0xb8   : > { %2666 = vmatpush3.xpose.msra.mxu0 %v409_v9  ;;  %v426_v9 = vld [vmem:[%s3698_s6 + $0x50] sm:$0xff] }
  0xb9   : > { %2667 = vmatprep.subr.mxu0 %v408_v10  ;;  %2719 = vmatprep.subr.mxu1 %v426_v9 }
  0xba   : > { %2720 = vmatpush3.msra.mxu1 %v426_v9 }
  0xbc   : > { %2668 = vmatpush3.xpose.msra.mxu0 %v408_v10 }
  0xbd   : > { %2669 = vmatprep.subr.mxu0 %v407_v11 }
  0xc0   : > { %2670 = vmatpush3.xpose.msra.mxu0 %v407_v11  ;;  %v3843_v11 = vld [vmem:[#allocation2 + $0x18] sm:$0xff] }
  0xc1   : > { %2671 = vmatprep.subr.mxu0 %v406_v12 }
  0xc4   : > { %2672 = vmatpush3.xpose.msra.mxu0 %v406_v12  ;;  %v425_v12 = vld [vmem:[%s3698_s6 + $0x48] sm:$0xff] }
  0xc5   : > { %2673 = vmatprep.subr.mxu0 %v405_v13  ;;  %2721 = vmatprep.subr.mxu1 %v425_v12 }
  0xc6   : > { %2722 = vmatpush3.msra.mxu1 %v425_v12 }
  0xc8   : > { %2674 = vmatpush3.xpose.msra.mxu0 %v405_v13 }
  0xc9   : > { %2675 = vmatprep.subr.mxu0 %v404_v14 }
  0xcc   : > { %2676 = vmatpush3.xpose.msra.mxu0 %v404_v14 }
  0xcd   : > { %2677 = vmatprep.subr.mxu0 %v403_v15 }
  0xd0   : > { %2678 = vmatpush3.xpose.msra.mxu0 %v403_v15  ;;  %v3849_v15 = vld [vmem:[#allocation2 + $0x8] sm:$0xff] }
  0xd1   : > { %2679 = vmatprep.subr.mxu0 %v402_v16 }
  0xd4   : > { %2680 = vmatpush3.xpose.msra.mxu0 %v402_v16  ;;  %v424_v16 = vld [vmem:[%s3698_s6 + $0x40] sm:$0xff] }
  0xd5   : > { %2681 = vmatprep.subr.mxu0 %v401_v17  ;;  %2723 = vmatprep.subr.mxu1 %v424_v16 }
  0xd6   : > { %2724 = vmatpush3.msra.mxu1 %v424_v16 }
  0xd8   : > { %2682 = vmatpush3.xpose.msra.mxu0 %v401_v17 }
  0xd9   : > { %2683 = vmatprep.subr.mxu0 %v400_v18 }
  0xdc   : > { %2684 = vmatpush3.xpose.msra.mxu0 %v400_v18 }
  0xdf   : > { %2686 = vmatmul.mubr.f32.vlgmr.msra.gmra.mxu0 %v385_v19  ;;  %v3858_v19 = vld [vmem:[#allocation2 + $0x10] sm:$0xff] }
  0xe0   : > { %2688 = vmatprep.mubr.f32.mxu0 %v386_v20  ;;  %v423_v20 = vld [vmem:[%s3698_s6 + $0x38] sm:$0xff] }
  0xe1   : > { %2725 = vmatprep.subr.mxu1 %v423_v20 }
  0xe2   : > { %2726 = vmatpush3.msra.mxu1 %v423_v20  ;;  %v3935_v20 = vld [vmem:[#allocation2 + $0x70] sm:$0xff] }
  0xe3   : > { %2689 = vmatmul.mubr.f32.gmra.mxu0 %v387_v21 }
  0xe4   : > { %2691 = vmatprep.mubr.f32.mxu0 %v388_v22 }
  0xe7   : > { %2692 = vmatmul.mubr.f32.gmra.mxu0 %v389_v23  ;;  %v3866_v23 = vld [vmem:[#allocation2 + $0x20] sm:$0xff] }
  0xe8   : > { %2694 = vmatprep.mubr.f32.mxu0 %v390_v24  ;;  %v422_v24 = vld [vmem:[%s3698_s6 + $0x30] sm:$0xff] }
  0xe9   : > { %2727 = vmatprep.subr.mxu1 %v422_v24 }
  0xea   : > { %2728 = vmatpush3.msra.mxu1 %v422_v24 }
  0xeb   : > { %2695 = vmatmul.mubr.f32.gmra.mxu0 %v391_v25 }
  0xec   : > { %2697 = vmatprep.mubr.f32.mxu0 %v392_v26  ;;  %v3875_v26 = vld [vmem:[#allocation2 + $0x28] sm:$0xff] }
  0xef   : > { %2698 = vmatmul.mubr.f32.gmra.mxu0 %v393_v27 }
  0xf0   : > { %2700 = vmatprep.mubr.f32.mxu0 %v394_v28  ;;  %v421_v28 = vld [vmem:[%s3698_s6 + $0x28] sm:$0xff] }
  0xf1   : > { %2729 = vmatprep.subr.mxu1 %v421_v28 }
  0xf2   : > { %2730 = vmatpush3.msra.mxu1 %v421_v28 }
  0xf3   : > { %2701 = vmatmul.mubr.f32.gmra.mxu0 %v395_v29 }
  0xf4   : > { %2703 = vmatprep.mubr.f32.mxu0 %v396_v30 }
  0xf7   : > { %2704 = vmatmul.mubr.f32.gmra.mxu0 %v397_v31  ;;  %v3883_v31 = vld [vmem:[#allocation2 + $0x30] sm:$0xff] }
  0xf8   : > { %2706 = vmatprep.mubr.f32.mxu0 %v398_v32  ;;  %v420_v32 = vld [vmem:[%s3698_s6 + $0x20] sm:$0xff] }
  0xf9   : > { %2731 = vmatprep.subr.mxu1 %v420_v32 }
  0xfa   : > { %2732 = vmatpush3.msra.mxu1 %v420_v32 }
  0xfb   : > { %2707 = vmatmul.mubr.f32.gmra.mxu0 %v399_v33 }
 0x19f   : > { %v2687_v34 = vpop.f32.mrf.mxu0 }
 0x1a0   : > { %v3792_v40 = vmul.f32 0.088388346, %v2687_v34  ;;  %v3890_v34 = vld [vmem:[#allocation2 + $0x38] sm:$0xff] }
 0x1a1   : > { %v498_v35 = vpop.f32.mrf.mxu0 }
 0x1a2   : > { %v3787_v36 = vmul.f32 0.088388346, %v498_v35 }
 0x1a3   : > { %v2690_v37 = vpop.f32.mrf.mxu0 }
 0x1a4   : > { %v3789_v38 = vmul.f32 0.088388346, %v2690_v37  ;;  %609 = vmax.xlane.f32.xlu0 %v3787_v36  ;;  %v419_v37 = vld [vmem:[%s3698_s6 + $0x18] sm:$0xff] }
 0x1a5   : > { %v508_v39 = vpop.f32.mrf.mxu0  ;;  %2733 = vmatprep.subr.mxu1 %v419_v37 }
 0x1a6   : > { %615 = vmax.xlane.f32.xlu1 %v3789_v38  ;;  %v3795_v41 = vmul.f32 0.088388346, %v508_v39  ;;  %2734 = vmatpush3.msra.mxu1 %v419_v37 }
 0x1a7   : > { %v2693_v42 = vpop.f32.mrf.mxu0 }
 0x1a8   : > { %611 = vmax.xlane.f32.xlu0 %v3792_v40  ;;  %v3799_v44 = vmul.f32 0.088388346, %v2693_v42 }
 0x1a9   : > { %v518_v43 = vpop.f32.mrf.mxu0 }
 0x1aa   : > { %613 = vmax.xlane.f32.xlu1 %v3795_v41  ;;  %v3801_v45 = vmul.f32 0.088388346, %v518_v43  ;;  %v3897_v43 = vld [vmem:[#allocation2 + $0x40] sm:$0xff] }
 0x1ab   : > { %v2696_v46 = vpop.f32.mrf.mxu0 }
 0x1ac   : > { %617 = vmax.xlane.f32.xlu0 %v3801_v45  ;;  %v3805_v48 = vmul.f32 0.088388346, %v2696_v46  ;;  %v418_v46 = vld [vmem:[%s3698_s6 + $0x10] sm:$0xff] }
 0x1ad   : > { %v528_v47 = vpop.f32.mrf.mxu0  ;;  %2735 = vmatprep.subr.mxu1 %v418_v46 }
 0x1ae   : > { %619 = vmax.xlane.f32.xlu1 %v3799_v44  ;;  %v3807_v49 = vmul.f32 0.088388346, %v528_v47  ;;  %2736 = vmatpush3.msra.mxu1 %v418_v46 }
 0x1af   : > { %v2699_v50 = vpop.f32.mrf.mxu0 }
 0x1b0   : > { %621 = vmax.xlane.f32.xlu0 %v3807_v49  ;;  %v3811_v53 = vmul.f32 0.088388346, %v2699_v50 }
 0x1b1   : > { %v538_v52 = vpop.f32.mrf.mxu0 }
 0x1b2   : > { %623 = vmax.xlane.f32.xlu1 %v3805_v48  ;;  %v3813_v54 = vmul.f32 0.088388346, %v538_v52 }
 0x1b3   : > { %v2702_v55 = vpop.f32.mrf.mxu0 }
 0x1b4   : > { %625 = vmax.xlane.f32.xlu0 %v3813_v54  ;;  %v3817_v57 = vmul.f32 0.088388346, %v2702_v55  ;;  %v417_v55 = vld [vmem:[%s3698_s6 + $0x8] sm:$0xff] }
 0x1b5   : > { %v548_v56 = vpop.f32.mrf.mxu0  ;;  %2737 = vmatprep.subr.mxu1 %v417_v55 }
 0x1b6   : > { %627 = vmax.xlane.f32.xlu1 %v3811_v53  ;;  %v3819_v58 = vmul.f32 0.088388346, %v548_v56  ;;  %2738 = vmatpush3.msra.mxu1 %v417_v55 }
 0x1b7   : > { %v2705_v59 = vpop.f32.mrf.mxu0 }
 0x1b8   : > { %629 = vmax.xlane.f32.xlu0 %v3819_v58  ;;  %v3823_v61 = vmul.f32 0.088388346, %v2705_v59 }
 0x1b9   : > { %v558_v60 = vpop.f32.mrf.mxu0 }
 0x1ba   : > { %631 = vmax.xlane.f32.xlu1 %v3817_v57  ;;  %v3825_v62 = vmul.f32 0.088388346, %v558_v60  ;;  %v3913_v60 = vld [vmem:[#allocation2 + $0x50] sm:$0xff] }
 0x1bb   : > { %v2708_v63 = vpop.f32.mrf.mxu0 }
 0x1bc   : > { %633 = vmax.xlane.f32.xlu0 %v3825_v62  ;;  %v3829_v1 = vmul.f32 0.088388346, %v2708_v63  ;;  %v416_v63 = vld [vmem:[%s3698_s6] sm:$0xff] }
 0x1bd   : > { %v568_v0 = vpop.f32.mrf.mxu0  ;;  %2739 = vmatprep.subr.mxu1 %v416_v63 }
 0x1be   : > { %635 = vmax.xlane.f32.xlu1 %v3823_v61  ;;  %v3831_v2 = vmul.f32 0.088388346, %v568_v0  ;;  %2740 = vmatpush3.msra.mxu1 %v416_v63 }
 0x1c0   : > { %637 = vmax.xlane.f32.xlu0 %v3831_v2 }
 0x1c2   : > { %639 = vmax.xlane.f32.xlu1 %v3829_v1 }
 0x22d   : > { %v610_v10 = vpop.xlane.xlu0 %609 }
 0x22e   : > { %v3847_v13 = vmax.f32 %v3840_v8, %v610_v10  ;;  %v3926_v10 = vld [vmem:[#allocation2 + $0x60] sm:$0xff] }
 0x22f   : > { %v616_v14 = vpop.xlane.xlu1 %615 }
 0x230   : > { %1219 = vst.msk [vmem:[#allocation2] sm:$0xff] %vm913_vm1, %v3847_v13  ;;  %v3855_v17 = vmax.f32 %v3843_v11, %v616_v14  ;;  %707 = vperm.xlu0 %3014, %v3847_v13   ;;  %v657_v47 = vsub.f32 %v3840_v8, %v3847_v13  ;;  %v606_v13 = vld [vmem:[#allocation2 + $0x68] sm:$0xff] }
 0x231   : > { %v612_v18 = vpop.xlane.xlu0 %611 }
 0x232   : > { %1222 = vst.msk [vmem:[#allocation2 + $0x18] sm:$0xff] %vm913_vm1, %v3855_v17  ;;  %v3864_v21 = vmax.f32 %v3849_v15, %v612_v18  ;;  %v673_v0 = vmul.f32 1.442695, %v657_v47  ;;  %v660_v3 = vsub.f32 %v3843_v11, %v3855_v17 }
 0x233   : > { %v614_v22 = vpop.xlane.xlu1 %613 }
 0x234   : > { %1220 = vst.msk [vmem:[#allocation2 + $0x8] sm:$0xff] %vm913_vm1, %v3864_v21  ;;  %v3872_v25 = vmax.f32 %v3858_v19, %v614_v22  ;;  %712 = vperm.xlu1 %3015, %v3864_v21   ;;  %3016 = vpow2.f32 %v673_v0  ;;  %v679_v11 = vmul.f32 1.442695, %v660_v3  ;;  %v658_v28 = vsub.f32 %v3849_v15, %v3864_v21 }
 0x235   : > { %v618_v27 = vpop.xlane.xlu0 %617 }
 0x236   : > { %1221 = vst.msk [vmem:[#allocation2 + $0x10] sm:$0xff] %vm913_vm1, %v3872_v25  ;;  %v3881_v29 = vmax.f32 %v3866_v23, %v618_v27  ;;  %3018 = vpow2.f32 %v679_v11  ;;  %v675_v15 = vmul.f32 1.442695, %v658_v28  ;;  %v659_v21 = vsub.f32 %v3858_v19, %v3872_v25 }
 0x237   : > { %v620_v30 = vpop.xlane.xlu1 %619 }
 0x238   : > { %v646_v33 = vmax.f32 %v3875_v26, %v620_v30  ;;  %722 = vperm.xlu1 %3015, %v3855_v17   ;;  %1223 = vst.msk [vmem:[#allocation2 + $0x20] sm:$0xff] %vm913_vm1, %v3881_v29  ;;  %v661_v19 = vsub.f32 %v3866_v23, %v3881_v29 }
 0x239   : > { %v622_v35 = vpop.xlane.xlu0 %621 }
 0x23a   : > { %1224 = vst.msk [vmem:[#allocation2 + $0x28] sm:$0xff] %vm913_vm1, %v646_v33  ;;  %v3895_v39 = vmax.f32 %v3883_v31, %v622_v35  ;;  %v662_v8 = vsub.f32 %v3875_v26, %v646_v33  ;;  %v3940_v26 = vld [vmem:[#allocation2 + $0x78] sm:$0xff] }
 0x23b   : > { %v624_v42 = vpop.xlane.xlu1 %623 }
 0x23c   : > { %v648_v50 = vmax.f32 %v3890_v34, %v624_v42  ;;  %717 = vperm.xlu1 %3015, %v3872_v25   ;;  %1225 = vst.msk [vmem:[#allocation2 + $0x30] sm:$0xff] %vm913_vm1, %v3895_v39  ;;  %v683_v17 = vmul.f32 1.442695, %v662_v8  ;;  %v663_v63 = vsub.f32 %v3883_v31, %v3895_v39 }
 0x23d   : > { %v626_v52 = vpop.xlane.xlu0 %625 }
 0x23e   : > { %1226 = vst.msk [vmem:[#allocation2 + $0x38] sm:$0xff] %vm913_vm1, %v648_v50  ;;  %v3911_v56 = vmax.f32 %v3897_v43, %v626_v52  ;;  %v664_v22 = vsub.f32 %v3890_v34, %v648_v50  ;;  %3020 = vpow2.f32 %v683_v17 }
 0x23f   : > { %v628_v59 = vpop.xlane.xlu1 %627 }
 0x240   : > { %v650_v4 = vmax.f32 %v3906_v51, %v628_v59  ;;  %732 = vperm.xlu1 %3015, %v646_v33   ;;  %1227 = vst.msk [vmem:[#allocation2 + $0x40] sm:$0xff] %vm913_vm1, %v3911_v56  ;;  %v687_v33 = vmul.f32 1.442695, %v664_v22  ;;  %v681_v59 = vmul.f32 1.442695, %v661_v19  ;;  %v665_v3 = vsub.f32 %v3897_v43, %v3911_v56 }
 0x241   : > { %v630_v6 = vpop.xlane.xlu0 %629 }
 0x242   : > { %1228 = vst.msk [vmem:[#allocation2 + $0x48] sm:$0xff] %vm913_vm1, %v650_v4  ;;  %752 = vperm.xlu0 %3014, %v650_v4   ;;  %v3923_v7 = vmax.f32 %v3913_v60, %v630_v6  ;;  %v666_v34 = vsub.f32 %v3906_v51, %v650_v4  ;;  %3022 = vpow2.f32 %v687_v33  ;;  %v677_v51 = vmul.f32 1.442695, %v659_v21 }
 0x243   : > { %v632_v9 = vpop.xlane.xlu1 %631  ;;  %3024 = vpow2.f32 %v675_v15  ;;  %v689_v31 = vmul.f32 1.442695, %v665_v3 }
 0x244   : > { %v652_v12 = vmax.f32 %v604_v5, %v632_v9  ;;  %727 = vperm.xlu1 %3015, %v3881_v29   ;;  %1229 = vst.msk [vmem:[#allocation2 + $0x50] sm:$0xff] %vm913_vm1, %v3923_v7  ;;  %v691_v46 = vmul.f32 1.442695, %v666_v34  ;;  %v685_v29 = vmul.f32 1.442695, %v663_v63 }
 0x245   : > { %v634_v14 = vpop.xlane.xlu0 %633 }
 0x246   : > { %1230 = vst.msk [vmem:[#allocation2 + $0x58] sm:$0xff] %vm913_vm1, %v652_v12  ;;  %762 = vperm.xlu0 %3014, %v652_v12   ;;  %v3933_v16 = vmax.f32 %v3926_v10, %v634_v14  ;;  %v668_v47 = vsub.f32 %v604_v5, %v652_v12  ;;  %3026 = vpow2.f32 %v691_v46 }
 0x247   : > { %v636_v18 = vpop.xlane.xlu1 %635  ;;  %3028 = vpow2.f32 %v677_v51 }
 0x248   : > { %v654_v24 = vmax.f32 %v606_v13, %v636_v18  ;;  %742 = vperm.xlu1 %3015, %v648_v50   ;;  %1231 = vst.msk [vmem:[#allocation2 + $0x60] sm:$0xff] %vm913_vm1, %v3933_v16  ;;  %v3965_v50 = vpop.eup %3016  ;;  %v695_v25 = vmul.f32 1.442695, %v668_v47 }
 0x249   : > { %v638_v27 = vpop.xlane.xlu0 %637  ;;  %v3971_v55 = vpop.eup %3018 }
 0x24a   : > { %1232 = vst.msk [vmem:[#allocation2 + $0x68] sm:$0xff] %vm913_vm1, %v654_v24  ;;  %772 = vperm.xlu0 %3014, %v654_v24   ;;  %v3946_v30 = vmax.f32 %v3935_v20, %v638_v27  ;;  %v670_v52 = vsub.f32 %v606_v13, %v654_v24  ;;  %3030 = vpow2.f32 %v695_v25 }
 0x24b   : > { %v640_v32 = vpop.xlane.xlu1 %639  ;;  %v3976_v0 = vpop.eup %3020  ;;  %3032 = vpow2.f32 %v681_v59 }
 0x24c   : > { %v3950_v35 = vmax.f32 %v3940_v26, %v640_v32  ;;  %737 = vperm.xlu1 %3015, %v3895_v39   ;;  %v671_v37 = vsub.f32 %v3935_v20, %v3946_v30  ;;  %1233 = vst.msk [vmem:[#allocation2 + $0x70] sm:$0xff] %vm913_vm1, %v3946_v30  ;;  %v699_v23 = vmul.f32 1.442695, %v670_v52  ;;  %v667_v39 = vsub.f32 %v3913_v60, %v3923_v7 }
 0x24e   : > { %v672_v42 = vsub.f32 %v3940_v26, %v3950_v35  ;;  %1234 = vst.msk [vmem:[#allocation2 + $0x78] sm:$0xff] %vm913_vm1, %v3950_v35  ;;  %782 = vperm.xlu0 %3014, %v3950_v35   ;;  %3034 = vpow2.f32 %v699_v23  ;;  %v693_v43 = vmul.f32 1.442695, %v667_v39 }
 0x24f   : > { %v3983_v4 = vpop.eup %3022  ;;  %3036 = vpow2.f32 %v685_v29 }
 0x250   : > { %747 = vperm.xlu1 %3015, %v3911_v56   ;;  %v3988_v5 = vpop.eup %3024  ;;  %3038 = vpow2.f32 %v689_v31  ;;  %v669_v56 = vsub.f32 %v3926_v10, %v3933_v16 }
 0x251   : > { %3040 = vpow2.f32 %v693_v43 }
 0x252   : > { %948 = vperm.xlu0 %3014, %v3965_v50  }
 0x253   : > { %v3991_v6 = vpop.eup %3026 }
 0x254   : > { %757 = vperm.xlu1 %3015, %v3923_v7   ;;  %v3996_v8 = vpop.eup %3028  ;;  %v697_v7 = vmul.f32 1.442695, %v669_v56 }
 0x256   : > { %963 = vperm.xlu0 %3014, %v3971_v55   ;;  %3042 = vpow2.f32 %v697_v7 }
 0x257   : > { %v3999_v60 = vpop.eup %3030 }
 0x258   : > { %767 = vperm.xlu1 %3015, %v3933_v16   ;;  %v4002_v9 = vpop.eup %3032 }
 0x25a   : > { %973 = vperm.xlu0 %3014, %v3976_v0  }
 0x25b   : > { %v4005_v11 = vpop.eup %3034 }
 0x25c   : > { %777 = vperm.xlu1 %3015, %v3946_v30   ;;  %v4008_v10 = vpop.eup %3036 }
 0x25d   : > { %v4011_v12 = vpop.eup %3038 }
 0x25e   : > { %983 = vperm.xlu0 %3014, %v3983_v4   ;;  %v4014_v13 = vpop.eup %3040 }
 0x260   : > { %953 = vperm.xlu1 %3015, %v3988_v5  }
 0x262   : > { %993 = vperm.xlu0 %3014, %v3991_v6  }
 0x263   : > { %v4017_v14 = vpop.eup %3042 }
 0x264   : > { %958 = vperm.xlu1 %3015, %v3996_v8  }
 0x266   : > { %1003 = vperm.xlu0 %3014, %v3999_v60  }
 0x268   : > { %968 = vperm.xlu1 %3015, %v4002_v9  }
 0x26a   : > { %1013 = vperm.xlu0 %3014, %v4005_v11  }
 0x26c   : > { %978 = vperm.xlu1 %3015, %v4008_v10  }
 0x270   : > { %988 = vperm.xlu1 %3015, %v4011_v12  }
 0x274   : > { %998 = vperm.xlu1 %3015, %v4014_v13  }
 0x278   : > { %1008 = vperm.xlu1 %3015, %v4017_v14  }
 0x2ab   : > { %v708_v16 = vpop.permute.xlu0 %707 }
 0x2ac   : > { %v785_v17 = vsub.f32 %v3787_v36, %v708_v16 }
 0x2ae   : > { %v801_v18 = vmul.f32 1.442695, %v785_v17 }
 0x2af   : > { %v713_v22 = vpop.permute.xlu1 %712 }
 0x2b0   : > { %3044 = vpow2.f32 %v801_v18  ;;  %v786_v24 = vsub.f32 %v3792_v40, %v713_v22 }
 0x2b2   : > { %v803_v27 = vmul.f32 1.442695, %v786_v24 }
 0x2b3   : > { %v723_v28 = vpop.permute.xlu1 %722 }
 0x2b4   : > { %3046 = vpow2.f32 %v803_v27  ;;  %v788_v32 = vsub.f32 %v3789_v38, %v723_v28 }
 0x2b6   : > { %v807_v33 = vmul.f32 1.442695, %v788_v32 }
 0x2b7   : > { %v718_v34 = vpop.permute.xlu1 %717 }
 0x2b8   : > { %3048 = vpow2.f32 %v807_v33  ;;  %v787_v15 = vsub.f32 %v3795_v41, %v718_v34 }
 0x2ba   : > { %v805_v21 = vmul.f32 1.442695, %v787_v15 }
 0x2bb   : > { %v733_v46 = vpop.permute.xlu1 %732 }
 0x2bc   : > { %3050 = vpow2.f32 %v805_v21  ;;  %v790_v36 = vsub.f32 %v3799_v44, %v733_v46 }
 0x2bd   : > { %v3045_v47 = vpop.eup %3044  ;;  %v753_v51 = vpop.permute.xlu0 %752 }
 0x2be   : > { %v811_v19 = vmul.f32 1.442695, %v790_v36  ;;  %865 = vadd.xlane.f32.xlu1 %v3045_v47  ;;  %2741 = vmatprep.mubr.f32.mxu1 %v3045_v47  ;;  %v794_v44 = vsub.f32 %v3811_v53, %v753_v51 }
 0x2bf   : > { %v728_v40 = vpop.permute.xlu1 %727 }
 0x2c0   : > { %3052 = vpow2.f32 %v811_v19  ;;  %v789_v25 = vsub.f32 %v3801_v45, %v728_v40  ;;  %v819_v43 = vmul.f32 1.442695, %v794_v44 }
 0x2c1   : > { %v3047_v38 = vpop.eup %3046  ;;  %v763_v59 = vpop.permute.xlu0 %762 }
 0x2c2   : > { %v809_v52 = vmul.f32 1.442695, %v789_v25  ;;  %867 = vadd.xlane.f32.xlu0 %v3047_v38  ;;  %2742 = vmatmul.mubr.f32.vlgmr.msra.gmra.mxu1 %v3047_v38  ;;  %v796_v56 = vsub.f32 %v3817_v57, %v763_v59  ;;  %v701_v38 = vmul.f32 1.442695, %v671_v37  ;;  %v703_v59 = vmul.f32 1.442695, %v672_v42 }
 0x2c3   : > { %v743_v41 = vpop.permute.xlu1 %742 }
 0x2c4   : > { %3054 = vpow2.f32 %v809_v52  ;;  %v792_v63 = vsub.f32 %v3805_v48, %v743_v41  ;;  %v823_v17 = vmul.f32 1.442695, %v796_v56 }
 0x2c5   : > { %v3049_v23 = vpop.eup %3048  ;;  %v773_v31 = vpop.permute.xlu0 %772 }
 0x2c6   : > { %v815_v29 = vmul.f32 1.442695, %v792_v63  ;;  %871 = vadd.xlane.f32.xlu1 %v3049_v23  ;;  %v798_v18 = vsub.f32 %v3823_v61, %v773_v31 }
 0x2c7   : > { %v738_v3 = vpop.permute.xlu1 %737 }
 0x2c8   : > { %3056 = vpow2.f32 %v815_v29  ;;  %v791_v39 = vsub.f32 %v3807_v49, %v738_v3  ;;  %v827_v28 = vmul.f32 1.442695, %v798_v18 }
 0x2c9   : > { %v3051_v45 = vpop.eup %3050  ;;  %v783_v22 = vpop.permute.xlu0 %782 }
 0x2ca   : > { %v813_v7 = vmul.f32 1.442695, %v791_v39  ;;  %869 = vadd.xlane.f32.xlu0 %v3051_v45  ;;  %2744 = vmatprep.mubr.f32.mxu1 %v3051_v45  ;;  %v800_v32 = vsub.f32 %v3829_v1, %v783_v22  ;;  %v836_v22 = vld [vmem:[#allocation3 + $0x18] sm:$0xff] }
 0x2cb   : > { %v748_v16 = vpop.permute.xlu1 %747  ;;  %2745 = vmatmul.mubr.f32.gmra.mxu1 %v3049_v23 }
 0x2cc   : > { %3058 = vpow2.f32 %v813_v7  ;;  %v793_v48 = vsub.f32 %v3813_v54, %v748_v16  ;;  %v831_v15 = vmul.f32 1.442695, %v800_v32 }
 0x2cd   : > { %v3053_v53 = vpop.eup %3052  ;;  %3060 = vpow2.f32 %v819_v43  ;;  %v4050_v37 = vpop.permute.xlu0 %948  ;;  %v833_v43 = vld [vmem:[#allocation3] sm:$0xff] }
 0x2ce   : > { %v817_v24 = vmul.f32 1.442695, %v793_v48  ;;  %875 = vadd.xlane.f32.xlu1 %v3053_v53  ;;  %v849_v56 = vmul.f32 %v3965_v50, %v833_v43  ;;  %v834_v48 = vld [vmem:[#allocation3 + $0x8] sm:$0xff]  ;;  %v843_v43 = vld [vmem:[#allocation3 + $0x50] sm:$0xff] }
 0x2cf   : > { %v758_v49 = vpop.permute.xlu1 %757 }
 0x2d0   : > { %3062 = vpow2.f32 %v817_v24  ;;  %v795_v57 = vsub.f32 %v3819_v58, %v758_v49  ;;  %v852_v49 = vmul.f32 %v3971_v55, %v836_v22 }
 0x2d1   : > { %v3055_v27 = vpop.eup %3054  ;;  %3064 = vpow2.f32 %v823_v17  ;;  %v4054_v23 = vpop.permute.xlu0 %963  ;;  %v850_v17 = vmul.f32 %v3988_v5, %v834_v48  ;;  %v859_v48 = vmul.f32 %v4014_v13, %v843_v43  ;;  %v847_v13 = vld [vmem:[#allocation3 + $0x70] sm:$0xff]  ;;  %v938_v43 = vld [vmem:[#allocation4 + $0x40] sm:$0xff] }
 0x2d2   : > { %v821_v33 = vmul.f32 1.442695, %v795_v57  ;;  %873 = vadd.xlane.f32.xlu0 %v3055_v27  ;;  %2747 = vmatprep.mubr.f32.mxu1 %v3055_v27  ;;  %v835_v27 = vld [vmem:[#allocation3 + $0x10] sm:$0xff] }
 0x2d3   : > { %v768_v54 = vpop.permute.xlu1 %767  ;;  %2748 = vmatmul.mubr.f32.gmra.mxu1 %v3053_v53  ;;  %v851_v50 = vmul.f32 %v3996_v8, %v835_v27 }
 0x2d4   : > { %3066 = vpow2.f32 %v821_v33  ;;  %v797_v61 = vsub.f32 %v3825_v62, %v768_v54  ;;  %v838_v33 = vld [vmem:[#allocation3 + $0x28] sm:$0xff] }
 0x2d5   : > { %v3057_v34 = vpop.eup %3056  ;;  %3068 = vpow2.f32 %v827_v28  ;;  %v4058_v26 = vpop.permute.xlu0 %973  ;;  %v854_v5 = vmul.f32 %v3976_v0, %v838_v33 }
 0x2d6   : > { %v825_v21 = vmul.f32 1.442695, %v797_v61  ;;  %879 = vadd.xlane.f32.xlu1 %v3057_v34 }
 0x2d7   : > { %v778_v46 = vpop.permute.xlu1 %777 }
 0x2d8   : > { %3070 = vpow2.f32 %v825_v21  ;;  %v799_v58 = vsub.f32 %v3831_v2, %v778_v46  ;;  %v840_v46 = vld [vmem:[#allocation3 + $0x38] sm:$0xff] }
 0x2d9   : > { %v3059_v36 = vpop.eup %3058  ;;  %3072 = vpow2.f32 %v831_v15  ;;  %v4062_v42 = vpop.permute.xlu0 %983  ;;  %v856_v8 = vmul.f32 %v3983_v4, %v840_v46  ;;  %v933_v46 = vld [vmem:[#allocation4 + $0x18] sm:$0xff] }
 0x2da   : > { %v3061_v1 = vpop.eup %3060  ;;  %v829_v47 = vmul.f32 1.442695, %v799_v58  ;;  %877 = vadd.xlane.f32.xlu0 %v3059_v36  ;;  %2750 = vmatprep.mubr.f32.mxu1 %v3059_v36 }
 0x2db   : > { %883 = vadd.xlane.f32.xlu1 %v3061_v1  ;;  %2751 = vmatmul.mubr.f32.gmra.mxu1 %v3057_v34  ;;  %v4048_v30 = vpop.permute.xlu1 %953  ;;  %v837_v34 = vld [vmem:[#allocation3 + $0x20] sm:$0xff] }
 0x2dc   : > { %3074 = vpow2.f32 %v829_v47  ;;  %v853_v55 = vmul.f32 %v4002_v9, %v837_v34 }
 0x2dd   : > { %v3063_v51 = vpop.eup %3062  ;;  %3076 = vpow2.f32 %v701_v38  ;;  %v4066_v3 = vpop.permute.xlu0 %993 }
 0x2de   : > { %v3065_v62 = vpop.eup %3064  ;;  %881 = vadd.xlane.f32.xlu0 %v3063_v51  ;;  %2753 = vmatprep.mubr.f32.mxu1 %v3063_v51  ;;  %3078 = vpow2.f32 %v703_v59  ;;  %v842_v51 = vld [vmem:[#allocation3 + $0x48] sm:$0xff] }
 0x2df   : > { %887 = vadd.xlane.f32.xlu1 %v3065_v62  ;;  %2754 = vmatmul.mubr.f32.gmra.mxu1 %v3061_v1  ;;  %v4052_v63 = vpop.permute.xlu1 %958  ;;  %v839_v1 = vld [vmem:[#allocation3 + $0x30] sm:$0xff] }
 0x2e0   : > { %v855_v0 = vmul.f32 %v4008_v10, %v839_v1 }
 0x2e1   : > { %v3067_v19 = vpop.eup %3066  ;;  %v4070_v39 = vpop.permute.xlu0 %1003 }
 0x2e2   : > { %v3069_v40 = vpop.eup %3068  ;;  %885 = vadd.xlane.f32.xlu0 %v3067_v19  ;;  %2756 = vmatprep.mubr.f32.mxu1 %v3067_v19 }
 0x2e3   : > { %891 = vadd.xlane.f32.xlu1 %v3069_v40  ;;  %2757 = vmatmul.mubr.f32.gmra.mxu1 %v3065_v62  ;;  %v4056_v44 = vpop.permute.xlu1 %968  ;;  %v858_v62 = vmul.f32 %v3991_v6, %v842_v51 }
 0x2e5   : > { %v3071_v2 = vpop.eup %3070  ;;  %v4075_v7 = vpop.permute.xlu0 %1013 }
 0x2e6   : > { %v3073_v25 = vpop.eup %3072  ;;  %889 = vadd.xlane.f32.xlu0 %v3071_v2  ;;  %2759 = vmatprep.mubr.f32.mxu1 %v3071_v2 }
 0x2e7   : > { %895 = vadd.xlane.f32.xlu1 %v3073_v25  ;;  %2760 = vmatmul.mubr.f32.gmra.mxu1 %v3069_v40  ;;  %v4060_v35 = vpop.permute.xlu1 %978  ;;  %v841_v40 = vld [vmem:[#allocation3 + $0x40] sm:$0xff] }
 0x2e8   : > { %v857_v4 = vmul.f32 %v4011_v12, %v841_v40  ;;  %v845_v12 = vld [vmem:[#allocation3 + $0x60] sm:$0xff] }
 0x2e9   : > { %v3075_v52 = vpop.eup %3074 }
 0x2ea   : > { %893 = vadd.xlane.f32.xlu0 %v3075_v52  ;;  %2762 = vmatprep.mubr.f32.mxu1 %v3075_v52  ;;  %v4042_v41 = vpop.eup %3076 }
 0x2eb   : > { %2763 = vmatmul.mubr.f32.gmra.mxu1 %v3073_v25  ;;  %v4045_v20 = vpop.eup %3078  ;;  %v4064_v29 = vpop.permute.xlu1 %988  ;;  %v844_v25 = vld [vmem:[#allocation3 + $0x58] sm:$0xff] }
 0x2ec   : > { %v860_v52 = vmul.f32 %v3999_v60, %v844_v25  ;;  %v936_v25 = vld [vmem:[#allocation4 + $0x8] sm:$0xff] }
 0x2ef   : > { %v4068_v31 = vpop.permute.xlu1 %998 }
 0x2f3   : > { %v4072_v45 = vpop.permute.xlu1 %1008 }
 0x2f8   : > { %1018 = vperm.xlu1 %3015, %v4042_v41  }
 0x300   : > { %1023 = vperm.xlu0 %3014, %v4045_v20  }
 0x347   : > { %v866_v16 = vpop.xlane.xlu1 %865 }
 0x348   : > { %v897_v53 = vadd.f32 %v866_v16, %v849_v56  ;;  %v846_v16 = vld [vmem:[#allocation3 + $0x68] sm:$0xff] }
 0x34a   : > { %914 = vst.msk [vmem:[#allocation3] sm:$0xff] %vm913_vm1, %v897_v53  ;;  %v862_v53 = vmul.f32 %v4005_v11, %v846_v16  ;;  %v863_v11 = vmul.f32 %v4042_v41, %v847_v13  ;;  %v932_v41 = vld [vmem:[#allocation4 + $0x58] sm:$0xff] }
 0x34b   : > { %v868_v18 = vpop.xlane.xlu0 %867 }
 0x34c   : > { %v898_v24 = vadd.f32 %v868_v18, %v850_v17 }
 0x34e   : > { %915 = vst.msk [vmem:[#allocation3 + $0x8] sm:$0xff] %vm913_vm1, %v898_v24  ;;  %v848_v24 = vld [vmem:[#allocation3 + $0x78] sm:$0xff] }
 0x34f   : > { %v872_v57 = vpop.xlane.xlu1 %871 }
 0x350   : > { %v900_v28 = vadd.f32 %v872_v57, %v852_v49  ;;  %v861_v49 = vmul.f32 %v4017_v14, %v845_v12  ;;  %v864_v57 = vmul.f32 %v4045_v20, %v848_v24  ;;  %v931_v14 = vld [vmem:[#allocation4] sm:$0xff] }
 0x351   : > { %v942_v24 = vld [vmem:[#allocation4 + $0x60] sm:$0xff] }
 0x352   : > { %917 = vst.msk [vmem:[#allocation3 + $0x18] sm:$0xff] %vm913_vm1, %v900_v28 }
 0x353   : > { %v870_v32 = vpop.xlane.xlu0 %869 }
 0x354   : > { %v899_v54 = vadd.f32 %v870_v32, %v851_v50 }
 0x356   : > { %916 = vst.msk [vmem:[#allocation3 + $0x10] sm:$0xff] %vm913_vm1, %v899_v54 }
 0x357   : > { %v876_v61 = vpop.xlane.xlu1 %875 }
 0x358   : > { %v902_v15 = vadd.f32 %v876_v61, %v854_v5  ;;  %v930_v5 = vld [vmem:[#allocation4 + $0x30] sm:$0xff]  ;;  %v1027_v61 = vmul.f32 %v4048_v30, %v931_v14  ;;  %v935_v30 = vld [vmem:[#allocation4 + $0x68] sm:$0xff] }
 0x359   : > { %v1026_v34 = vmul.f32 %v4050_v37, %v930_v5  ;;  %v1031_v37 = vmul.f32 %v4058_v26, %v935_v30 }
 0x35a   : > { %919 = vst.msk [vmem:[#allocation3 + $0x28] sm:$0xff] %vm913_vm1, %v902_v15 }
 0x35b   : > { %v874_v21 = vpop.xlane.xlu0 %873 }
 0x35c   : > { %v901_v58 = vadd.f32 %v874_v21, %v853_v55 }
 0x35e   : > { %918 = vst.msk [vmem:[#allocation3 + $0x20] sm:$0xff] %vm913_vm1, %v901_v58  ;;  %v1029_v58 = vmul.f32 %v4054_v23, %v933_v46  ;;  %v937_v23 = vld [vmem:[#allocation4 + $0x48] sm:$0xff] }
 0x35f   : > { %v880_v36 = vpop.xlane.xlu1 %879 }
 0x360   : > { %v904_v47 = vadd.f32 %v880_v36, %v856_v8  ;;  %v1028_v36 = vmul.f32 %v4052_v63, %v932_v41  ;;  %v1033_v63 = vmul.f32 %v4062_v42, %v937_v23 }
 0x362   : > { %921 = vst.msk [vmem:[#allocation3 + $0x38] sm:$0xff] %vm913_vm1, %v904_v47 }
 0x363   : > { %v878_v19 = vpop.xlane.xlu0 %877 }
 0x364   : > { %v884_v9 = vpop.xlane.xlu1 %883  ;;  %v903_v2 = vadd.f32 %v878_v19, %v855_v0  ;;  %v934_v0 = vld [vmem:[#allocation4 + $0x50] sm:$0xff] }
 0x365   : > { %v906_v38 = vadd.f32 %v884_v9, %v858_v62  ;;  %v1030_v19 = vmul.f32 %v4056_v44, %v934_v0 }
 0x366   : > { %920 = vst.msk [vmem:[#allocation3 + $0x30] sm:$0xff] %vm913_vm1, %v903_v2 }
 0x367   : > { %923 = vst.msk [vmem:[#allocation3 + $0x48] sm:$0xff] %vm913_vm1, %v906_v38  ;;  %v882_v59 = vpop.xlane.xlu0 %881  ;;  %v939_v38 = vld [vmem:[#allocation4 + $0x20] sm:$0xff] }
 0x368   : > { %v888_v56 = vpop.xlane.xlu1 %887  ;;  %v905_v10 = vadd.f32 %v882_v59, %v857_v4  ;;  %v1035_v26 = vmul.f32 %v4066_v3, %v939_v38 }
 0x369   : > { %v908_v6 = vadd.f32 %v888_v56, %v860_v52  ;;  %v1032_v52 = vmul.f32 %v4060_v35, %v936_v25  ;;  %v943_v35 = vld [vmem:[#allocation4 + $0x70] sm:$0xff] }
 0x36a   : > { %922 = vst.msk [vmem:[#allocation3 + $0x40] sm:$0xff] %vm913_vm1, %v905_v10  ;;  %v941_v10 = vld [vmem:[#allocation4 + $0x38] sm:$0xff] }
 0x36b   : > { %925 = vst.msk [vmem:[#allocation3 + $0x58] sm:$0xff] %vm913_vm1, %v908_v6  ;;  %v886_v17 = vpop.xlane.xlu0 %885  ;;  %v1034_v6 = vmul.f32 %v4064_v29, %v938_v43  ;;  %v1037_v42 = vmul.f32 %v4070_v39, %v941_v10 }
 0x36c   : > { %v892_v18 = vpop.xlane.xlu1 %891  ;;  %v907_v22 = vadd.f32 %v886_v17, %v859_v48 }
 0x36d   : > { %v910_v60 = vadd.f32 %v892_v18, %v862_v53  ;;  %v940_v53 = vld [vmem:[#allocation4 + $0x10] sm:$0xff] }
 0x36e   : > { %924 = vst.msk [vmem:[#allocation3 + $0x50] sm:$0xff] %vm913_vm1, %v907_v22  ;;  %v1036_v22 = vmul.f32 %v4068_v31, %v940_v53 }
 0x36f   : > { %927 = vst.msk [vmem:[#allocation3 + $0x68] sm:$0xff] %vm913_vm1, %v910_v60  ;;  %v890_v27 = vpop.xlane.xlu0 %889 }
 0x370   : > { %v896_v28 = vpop.xlane.xlu1 %895  ;;  %v909_v50 = vadd.f32 %v890_v27, %v861_v49  ;;  %v1039_v49 = vmul.f32 %v4075_v7, %v943_v35 }
 0x371   : > { %v912_v32 = vadd.f32 %v896_v28, %v864_v57  ;;  %v945_v57 = vld [vmem:[#allocation4 + $0x28] sm:$0xff]  ;;  %v1038_v28 = vmul.f32 %v4072_v45, %v942_v24 }
 0x372   : > { %926 = vst.msk [vmem:[#allocation3 + $0x60] sm:$0xff] %vm913_vm1, %v909_v50  ;;  %v944_v50 = vld [vmem:[#allocation4 + $0x78] sm:$0xff] }
 0x373   : > { %929 = vst.msk [vmem:[#allocation3 + $0x78] sm:$0xff] %vm913_vm1, %v912_v32  ;;  %v894_v33 = vpop.xlane.xlu0 %893 }
 0x374   : > { %v911_v54 = vadd.f32 %v894_v33, %v863_v11  ;;  %v1019_v32 = vpop.permute.xlu1 %1018 }
 0x375   : > { %v1040_v14 = vmul.f32 %v1019_v32, %v944_v50 }
 0x376   : > { %928 = vst.msk [vmem:[#allocation3 + $0x70] sm:$0xff] %vm913_vm1, %v911_v54 }
 0x37b   : > { %v1024_v27 = vpop.permute.xlu0 %1023 }
 0x37c   : > { %v1041_v33 = vmul.f32 %v1024_v27, %v945_v57 }
 0x382   : > { %v2743_v20 = vpop.f32.mrf.mxu1 }
 0x383   : > { %v1188_v15 = vadd.f32 %v2743_v20, %v1027_v61 }
 0x384   : > { %v1108_v55 = vpop.f32.mrf.mxu1 }
 0x385   : > { %1204 = vst [vmem:[#allocation4] sm:$0xff] %v1188_v15  ;;  %v1187_v21 = vadd.f32 %v1108_v55, %v1026_v34 }
 0x387   : > { %1203 = vst [vmem:[#allocation4 + $0x30] sm:$0xff] %v1187_v21 }
 0x38b   : > { %v2746_v8 = vpop.f32.mrf.mxu1 }
 0x38c   : > { %v1190_v1 = vadd.f32 %v2746_v8, %v1029_v58 }
 0x38d   : > { %v1118_v47 = vpop.f32.mrf.mxu1 }
 0x38e   : > { %1206 = vst [vmem:[#allocation4 + $0x18] sm:$0xff] %v1190_v1  ;;  %v1189_v51 = vadd.f32 %v1118_v47, %v1028_v36 }
 0x390   : > { %1205 = vst [vmem:[#allocation4 + $0x58] sm:$0xff] %v1189_v51 }
 0x393   : > { %v2749_v62 = vpop.f32.mrf.mxu1 }
 0x394   : > { %v1192_v40 = vadd.f32 %v2749_v62, %v1031_v37 }
 0x395   : > { %v1128_v9 = vpop.f32.mrf.mxu1 }
 0x396   : > { %1208 = vst [vmem:[#allocation4 + $0x68] sm:$0xff] %v1192_v40  ;;  %v1191_v2 = vadd.f32 %v1128_v9, %v1030_v19 }
 0x398   : > { %1207 = vst [vmem:[#allocation4 + $0x50] sm:$0xff] %v1191_v2 }
 0x39b   : > { %v2752_v4 = vpop.f32.mrf.mxu1 }
 0x39c   : > { %v1194_v59 = vadd.f32 %v2752_v4, %v1033_v63 }
 0x39d   : > { %v1138_v56 = vpop.f32.mrf.mxu1 }
 0x39e   : > { %1210 = vst [vmem:[#allocation4 + $0x48] sm:$0xff] %v1194_v59  ;;  %v1193_v44 = vadd.f32 %v1138_v56, %v1032_v52 }
 0x39f   : > { %v2755_v16 = vpop.f32.mrf.mxu1 }
 0x3a0   : > { %1209 = vst [vmem:[#allocation4 + $0x8] sm:$0xff] %v1193_v44  ;;  %v1196_v48 = vadd.f32 %v2755_v16, %v1035_v26 }
 0x3a1   : > { %v1148_v17 = vpop.f32.mrf.mxu1 }
 0x3a2   : > { %1212 = vst [vmem:[#allocation4 + $0x20] sm:$0xff] %v1196_v48  ;;  %v1195_v12 = vadd.f32 %v1148_v17, %v1034_v6 }
 0x3a3   : > { %v2758_v18 = vpop.f32.mrf.mxu1 }
 0x3a4   : > { %1211 = vst [vmem:[#allocation4 + $0x40] sm:$0xff] %v1195_v12  ;;  %v1198_v3 = vadd.f32 %v2758_v18, %v1037_v42 }
 0x3a5   : > { %v1158_v60 = vpop.f32.mrf.mxu1 }
 0x3a6   : > { %1214 = vst [vmem:[#allocation4 + $0x38] sm:$0xff] %v1198_v3  ;;  %v1197_v29 = vadd.f32 %v1158_v60, %v1036_v22 }
 0x3a7   : > { %v2761_v13 = vpop.f32.mrf.mxu1 }
 0x3a8   : > { %1213 = vst [vmem:[#allocation4 + $0x10] sm:$0xff] %v1197_v29  ;;  %v1200_v39 = vadd.f32 %v2761_v13, %v1039_v49 }
 0x3a9   : > { %v1168_v11 = vpop.f32.mrf.mxu1 }
 0x3aa   : > { %1216 = vst [vmem:[#allocation4 + $0x70] sm:$0xff] %v1200_v39  ;;  %v1199_v31 = vadd.f32 %v1168_v11, %v1038_v28 }
 0x3ab   : > { %v2764_v54 = vpop.f32.mrf.mxu1 }
 0x3ac   : > { %1215 = vst [vmem:[#allocation4 + $0x60] sm:$0xff] %v1199_v31  ;;  %v1202_v5 = vadd.f32 %v2764_v54, %v1041_v33 }
 0x3ad   : > { %v1178_v7 = vpop.f32.mrf.mxu1 }
 0x3ae   : > { %1218 = vst [vmem:[#allocation4 + $0x28] sm:$0xff] %v1202_v5  ;;  %v1201_v61 = vadd.f32 %v1178_v7, %v1040_v14 }
 0x3b0   : > { %1217 = vst [vmem:[#allocation4 + $0x78] sm:$0xff] %v1201_v61 }
 0x3b1 PF: > { %p1236_p9 = pnand %p2513_p4, %p3744_p3 }
 0x3b3   : > { %1239 = sbr.rel (%p1236_p9) target bundleno = 1740 (0x6cc), region = 56 }
 0x3b8   : > { %v1271_v45 = vld [vmem:[%s3692_s12 + $0x78] sm:$0xff]  ;;  %v1270_v20 = vld [vmem:[%s3692_s12 + $0x70] sm:$0xff]  ;;  %v1269_v34 = vld [vmem:[%s3692_s12 + $0x68] sm:$0xff]  ;;  %v1449_v44 = vlaneseq  ;;  %v4163_v48 = vstv %s3739_s19 }
 0x3b9   : > { %2765 = vmatprep.subr.mxu0 %v1271_v45  ;;  %v1240_v15 = vld [vmem:[%s3684_s8] sm:$0xff]  ;;  %v1267_v21 = vld [vmem:[%s3692_s12 + $0x58] sm:$0xff]  ;;  %v1266_v46 = vld [vmem:[%s3692_s12 + $0x50] sm:$0xff]  ;;  %v1485_v53 = vstv %s3736_s11 }
 0x3ba   : > { %2766 = vmatpush3.xpose.msra.mxu0 %v1271_v45  ;;  %2797 = vmatprep.mubr.f32.mxu0 %v1240_v15  ;;  %v1268_v55 = vld [vmem:[%s3692_s12 + $0x60] sm:$0xff]  ;;  %v1265_v41 = vld [vmem:[%s3692_s12 + $0x48] sm:$0xff]  ;;  %v1263_v8 = vld [vmem:[%s3692_s12 + $0x38] sm:$0xff]  ;;  %v4159_v10 = vshrl.u32 %v1449_v44, 7  ;;  %v1484_v16 = vand.u32 127, %v1449_v44 }
 0x3bb   : > { %2767 = vmatprep.subr.mxu0 %v1270_v20  ;;  %v1264_v58 = vld [vmem:[%s3692_s12 + $0x40] sm:$0xff]  ;;  %v1262_v36 = vld [vmem:[%s3692_s12 + $0x30] sm:$0xff]  ;;  %v1261_v1 = vld [vmem:[%s3692_s12 + $0x28] sm:$0xff] }
 0x3bc   : > { %v1260_v47 = vld [vmem:[%s3692_s12 + $0x20] sm:$0xff]  ;;  %v1259_v51 = vld [vmem:[%s3692_s12 + $0x18] sm:$0xff]  ;;  %v1258_v30 = vld [vmem:[%s3692_s12 + $0x10] sm:$0xff]  ;;  %v1453_v6 = vadd.s32 24, %v4159_v10  ;;  %v1467_v17 = vadd.s32 %v4163_v48, %v4159_v10  ;;  %v1451_v42 = vadd.s32 8, %v4159_v10  ;;  %v1452_v12 = vadd.s32 16, %v4159_v10 }
 0x3bd   : > { %v1257_v0 = vld [vmem:[%s3692_s12 + $0x8] sm:$0xff]  ;;  %v1256_v37 = vld [vmem:[%s3692_s12] sm:$0xff]  ;;  %v1242_v19 = vld [vmem:[%s3684_s8 + $0x10] sm:$0xff]  ;;  %v4170_v18 = vadd.s32 %v1485_v53, %v1484_v16  ;;  %v1455_v3 = vadd.s32 40, %v4159_v10  ;;  %v1454_v29 = vadd.s32 32, %v4159_v10  ;;  %v1457_v28 = vadd.s32 56, %v4159_v10 }
 0x3be   : > { %2768 = vmatpush3.xpose.msra.mxu0 %v1270_v20  ;;  %v1241_v62 = vld [vmem:[%s3684_s8 + $0x8] sm:$0xff]  ;;  %v1243_v40 = vld [vmem:[%s3684_s8 + $0x18] sm:$0xff]  ;;  %v1244_v9 = vld [vmem:[%s3684_s8 + $0x20] sm:$0xff]  ;;  %v1470_v22 = vadd.s32 %v4163_v48, %v1453_v6  ;;  %v1468_v60 = vadd.s32 %v4163_v48, %v1451_v42  ;;  %v1469_v49 = vadd.s32 %v4163_v48, %v1452_v12  ;;  %v1456_v31 = vadd.s32 48, %v4159_v10 }
 0x3bf   : > { %2769 = vmatprep.subr.mxu0 %v1269_v34  ;;  %v1245_v2 = vld [vmem:[%s3684_s8 + $0x28] sm:$0xff]  ;;  %v1246_v23 = vld [vmem:[%s3684_s8 + $0x30] sm:$0xff]  ;;  %v1247_v25 = vld [vmem:[%s3684_s8 + $0x38] sm:$0xff]  ;;  %vm1487_vm2 = vcmp.le.s32.totalorder %v4170_v18, %v1467_v17  ;;  %v1472_v13 = vadd.s32 %v4163_v48, %v1455_v3  ;;  %v1471_v33 = vadd.s32 %v4163_v48, %v1454_v29  ;;  %v1474_v20 = vadd.s32 %v4163_v48, %v1457_v28 }
 0x3c0   : > { %v1248_v63 = vld [vmem:[%s3684_s8 + $0x40] sm:$0xff]  ;;  %v1249_v38 = vld [vmem:[%s3684_s8 + $0x48] sm:$0xff]  ;;  %v1250_v4 = vld [vmem:[%s3684_s8 + $0x50] sm:$0xff]  ;;  %vm1490_vm3 = vcmp.le.s32.totalorder %v4170_v18, %v1470_v22  ;;  %vm1488_vm4 = vcmp.le.s32.totalorder %v4170_v18, %v1468_v60  ;;  %vm1489_vm5 = vcmp.le.s32.totalorder %v4170_v18, %v1469_v49  ;;  %v1459_v15 = vadd.s32 72, %v4159_v10 }
 0x3c1   : > { %v1251_v52 = vld [vmem:[%s3684_s8 + $0x58] sm:$0xff]  ;;  %v1252_v59 = vld [vmem:[%s3684_s8 + $0x60] sm:$0xff]  ;;  %v1253_v43 = vld [vmem:[%s3684_s8 + $0x68] sm:$0xff]  ;;  %vm1492_vm6 = vcmp.le.s32.totalorder %v4170_v18, %v1472_v13  ;;  %vm1491_vm7 = vcmp.le.s32.totalorder %v4170_v18, %v1471_v33  ;;  %vm1494_vm8 = vcmp.le.s32.totalorder %v4170_v18, %v1474_v20  ;;  %v1465_v6 = vadd.s32 120, %v4159_v10 }
 0x3c2   : > { %2770 = vmatpush3.xpose.msra.mxu0 %v1269_v34  ;;  %v1254_v56 = vld [vmem:[%s3684_s8 + $0x70] sm:$0xff]  ;;  %v1255_v26 = vld [vmem:[%s3684_s8 + $0x78] sm:$0xff]  ;;  %v1464_v17 = vadd.s32 112, %v4159_v10 }
 0x3c3   : > { %2771 = vmatprep.subr.mxu0 %v1268_v55  ;;  %v1482_v60 = vadd.s32 %v4163_v48, %v1465_v6  ;;  %v1286_v33 = vld [vmem:[%s3698_s6 + $0x70] sm:$0xff] }
 0x3c5   : > { %vm1502_vm0 = vcmp.le.s32.totalorder %v4170_v18, %v1482_v60 }
 0x3c6   : > { %2772 = vmatpush3.xpose.msra.mxu0 %v1268_v55  ;;  %v1473_v55 = vadd.s32 %v4163_v48, %v1456_v31  ;;  %v1285_v31 = vld [vmem:[%s3698_s6 + $0x68] sm:$0xff] }
 0x3c7   : > { %2773 = vmatprep.subr.mxu0 %v1267_v21 }
 0x3c8   : > { %vm1493_vm9 = vcmp.le.s32.totalorder %v4170_v18, %v1473_v55 }
 0x3ca   : > { %2774 = vmatpush3.xpose.msra.mxu0 %v1267_v21  ;;  %v1458_v21 = vadd.s32 64, %v4159_v10 }
 0x3cb   : > { %2775 = vmatprep.subr.mxu0 %v1266_v46 }
 0x3ce   : > { %2776 = vmatpush3.xpose.msra.mxu0 %v1266_v46 }
 0x3cf   : > { %2777 = vmatprep.subr.mxu0 %v1265_v41 }
 0x3d2   : > { %2778 = vmatpush3.xpose.msra.mxu0 %v1265_v41 }
 0x3d3   : > { %2779 = vmatprep.subr.mxu0 %v1264_v58 }
 0x3d6   : > { %2780 = vmatpush3.xpose.msra.mxu0 %v1264_v58  ;;  %v1461_v58 = vadd.s32 88, %v4159_v10 }
 0x3d7   : > { %2781 = vmatprep.subr.mxu0 %v1263_v8 }
 0x3da   : > { %2782 = vmatpush3.xpose.msra.mxu0 %v1263_v8 }
 0x3db   : > { %2783 = vmatprep.subr.mxu0 %v1262_v36 }
 0x3de   : > { %2784 = vmatpush3.xpose.msra.mxu0 %v1262_v36 }
 0x3df   : > { %2785 = vmatprep.subr.mxu0 %v1261_v1 }
 0x3e2   : > { %2786 = vmatpush3.xpose.msra.mxu0 %v1261_v1 }
 0x3e3   : > { %2787 = vmatprep.subr.mxu0 %v1260_v47 }
 0x3e6   : > { %2788 = vmatpush3.xpose.msra.mxu0 %v1260_v47 }
 0x3e7   : > { %2789 = vmatprep.subr.mxu0 %v1259_v51 }
 0x3ea   : > { %2790 = vmatpush3.xpose.msra.mxu0 %v1259_v51  ;;  %v1476_v51 = vadd.s32 %v4163_v48, %v1459_v15  ;;  %v1281_v15 = vld [vmem:[%s3698_s6 + $0x48] sm:$0xff] }
 0x3eb   : > { %2791 = vmatprep.subr.mxu0 %v1258_v30 }
 0x3ec   : > { %vm1496_vm10 = vcmp.le.s32.totalorder %v4170_v18, %v1476_v51  ;;  %v1279_v51 = vld [vmem:[%s3698_s6 + $0x38] sm:$0xff] }
 0x3ee   : > { %2792 = vmatpush3.xpose.msra.mxu0 %v1258_v30  ;;  %v1475_v30 = vadd.s32 %v4163_v48, %v1458_v21 }
 0x3ef   : > { %2793 = vmatprep.subr.mxu0 %v1257_v0 }
 0x3f0   : > { %vm1495_vm11 = vcmp.le.s32.totalorder %v4170_v18, %v1475_v30 }
 0x3f2   : > { %2794 = vmatpush3.xpose.msra.mxu0 %v1257_v0  ;;  %v1460_v0 = vadd.s32 80, %v4159_v10 }
 0x3f3   : > { %2795 = vmatprep.subr.mxu0 %v1256_v37 }
 0x3f6   : > { %2796 = vmatpush3.xpose.msra.mxu0 %v1256_v37 }
 0x3f9   : > { %2798 = vmatmul.mubr.f32.vlgmr.msra.gmra.mxu0 %v1241_v62 }
 0x3fa   : > { %2800 = vmatprep.mubr.f32.mxu0 %v1242_v19  ;;  %v1478_v19 = vadd.s32 %v4163_v48, %v1461_v58 }
 0x3fc   : > { %vm1498_vm12 = vcmp.le.s32.totalorder %v4170_v18, %v1478_v19 }
 0x3fd   : > { %2801 = vmatmul.mubr.f32.gmra.mxu0 %v1243_v40  ;;  %v1463_v40 = vadd.s32 104, %v4159_v10 }
 0x3fe   : > { %2803 = vmatprep.mubr.f32.mxu0 %v1244_v9 }
 0x401   : > { %2804 = vmatmul.mubr.f32.gmra.mxu0 %v1245_v2 }
 0x402   : > { %2806 = vmatprep.mubr.f32.mxu0 %v1246_v23 }
 0x405   : > { %2807 = vmatmul.mubr.f32.gmra.mxu0 %v1247_v25  ;;  %v3414_v25 = vmov 0  }
 0x406   : > { %2809 = vmatprep.mubr.f32.mxu0 %v1248_v63  ;;  %3080 = vset.pattern.permute.xlu0 %v3414_v25 }
 0x407   : > { %3081 = vset.pattern.permute.xlu1 %v3414_v25  ;;  %v1277_v25 = vld [vmem:[%s3698_s6 + $0x28] sm:$0xff] }
 0x409   : > { %2810 = vmatmul.mubr.f32.gmra.mxu0 %v1249_v38  ;;  %v1477_v38 = vadd.s32 %v4163_v48, %v1460_v0 }
 0x40a   : > { %2812 = vmatprep.mubr.f32.mxu0 %v1250_v4  ;;  %v1462_v4 = vadd.s32 96, %v4159_v10  ;;  %v1481_v10 = vadd.s32 %v4163_v48, %v1464_v17  ;;  %v4325_v17 = vld [vmem:[#allocation2 + $0x40] sm:$0xff] }
 0x40b   : > { %vm1497_vm13 = vcmp.le.s32.totalorder %v4170_v18, %v1477_v38 }
 0x40c   : > { %v1479_v53 = vadd.s32 %v4163_v48, %v1462_v4  ;;  %vm1501_vm1 = vcmp.le.s32.totalorder %v4170_v18, %v1481_v10  ;;  %v4311_v4 = vld [vmem:[#allocation2 + $0x30] sm:$0xff]  ;;  %v1273_v10 = vld [vmem:[%s3698_s6 + $0x8] sm:$0xff] }
 0x40d   : > { %2813 = vmatmul.mubr.f32.gmra.mxu0 %v1251_v52 }
 0x40e   : > { %2815 = vmatprep.mubr.f32.mxu0 %v1252_v59  ;;  %vm1499_vm15 = vcmp.le.s32.totalorder %v4170_v18, %v1479_v53 }
 0x411   : > { %2816 = vmatmul.mubr.f32.gmra.mxu0 %v1253_v43 }
 0x412   : > { %2818 = vmatprep.mubr.f32.mxu0 %v1254_v56 }
 0x415   : > { %2819 = vmatmul.mubr.f32.gmra.mxu0 %v1255_v26  ;;  %v1480_v26 = vadd.s32 %v4163_v48, %v1463_v40  ;;  %v4303_v40 = vld [vmem:[#allocation2 + $0x28] sm:$0xff] }
 0x417   : > { %vm1500_vm14 = vcmp.le.s32.totalorder %v4170_v18, %v1480_v26  ;;  %v1284_v18 = vld [vmem:[%s3698_s6 + $0x60] sm:$0xff] }
 0x4b9   : > { %v2799_v35 = vpop.f32.mrf.mxu0 }
 0x4ba   : > { %v1434_v39 = vmul.f32 0.088388346, %v2799_v35 }
 0x4bb   : > { %v1354_v24 = vpop.f32.mrf.mxu0 }
 0x4bc   : > { %v1433_v57 = vmul.f32 0.088388346, %v1354_v24  ;;  %v4192_v7 = vsel %vm1488_vm4, %v1434_v39, -1e+30 }
 0x4bd   : > { %v2802_v27 = vpop.f32.mrf.mxu0 }
 0x4be   : > { %v1436_v50 = vmul.f32 0.088388346, %v2802_v27  ;;  %v4181_v32 = vsel %vm1487_vm2, %v1433_v57, -1e+30  ;;  %vm1839_vm2 = vcmask 7168  }
 0x4bf   : > { %1535 = vmax.xlane.f32.xlu0 %v4181_v32  ;;  %v1364_v11 = vpop.f32.mrf.mxu0 }
 0x4c0   : > { %v4188_v54 = vsel %vm1490_vm3, %v1436_v50, -1e+30  ;;  %v1435_v14 = vmul.f32 0.088388346, %v1364_v11  ;;  %v1287_v11 = vld [vmem:[%s3698_s6 + $0x78] sm:$0xff] }
 0x4c1   : > { %1541 = vmax.xlane.f32.xlu1 %v4188_v54  ;;  %v2805_v5 = vpop.f32.mrf.mxu0  ;;  %2821 = vmatprep.subr.mxu1 %v1287_v11 }
 0x4c2   : > { %v4194_v61 = vsel %vm1489_vm5, %v1435_v14, -1e+30  ;;  %v1438_v45 = vmul.f32 0.088388346, %v2805_v5  ;;  %2822 = vmatpush3.msra.mxu1 %v1287_v11  ;;  %v1283_v14 = vld [vmem:[%s3698_s6 + $0x58] sm:$0xff]  ;;  %v4268_v5 = vld [vmem:[#allocation2] sm:$0xff] }
 0x4c3   : > { %1537 = vmax.xlane.f32.xlu0 %v4192_v7  ;;  %v1374_v34 = vpop.f32.mrf.mxu0  ;;  %2823 = vmatprep.subr.mxu1 %v1286_v33 }
 0x4c4   : > { %v1437_v46 = vmul.f32 0.088388346, %v1374_v34  ;;  %v4204_v8 = vsel %vm1492_vm6, %v1438_v45, -1e+30  ;;  %2824 = vmatpush3.msra.mxu1 %v1286_v33  ;;  %v1282_v45 = vld [vmem:[%s3698_s6 + $0x50] sm:$0xff]  ;;  %v4271_v34 = vld [vmem:[#allocation2 + $0x18] sm:$0xff] }
 0x4c5   : > { %1539 = vmax.xlane.f32.xlu1 %v4194_v61  ;;  %v2808_v41 = vpop.f32.mrf.mxu0  ;;  %2825 = vmatprep.subr.mxu1 %v1285_v31 }
 0x4c6   : > { %v1440_v36 = vmul.f32 0.088388346, %v2808_v41  ;;  %v4207_v1 = vsel %vm1491_vm7, %v1437_v46, -1e+30  ;;  %2826 = vmatpush3.msra.mxu1 %v1285_v31  ;;  %v4277_v46 = vld [vmem:[#allocation2 + $0x8] sm:$0xff]  ;;  %v1280_v41 = vld [vmem:[%s3698_s6 + $0x40] sm:$0xff] }
 0x4c7   : > { %v1384_v47 = vpop.f32.mrf.mxu0  ;;  %1543 = vmax.xlane.f32.xlu0 %v4207_v1  ;;  %2827 = vmatprep.subr.mxu1 %v1284_v18  ;;  %v1530_v31 = vld [vmem:[#allocation2 + $0x58] sm:$0xff] }
 0x4c8   : > { %v1439_v37 = vmul.f32 0.088388346, %v1384_v47  ;;  %v4217_v9 = vsel %vm1494_vm8, %v1440_v36, -1e+30  ;;  %2828 = vmatpush3.msra.mxu1 %v1284_v18  ;;  %v4286_v47 = vld [vmem:[#allocation2 + $0x10] sm:$0xff] }
 0x4c9   : > { %1545 = vmax.xlane.f32.xlu1 %v4204_v8  ;;  %v2811_v62 = vpop.f32.mrf.mxu0  ;;  %2829 = vmatprep.subr.mxu1 %v1283_v14 }
 0x4ca   : > { %v1442_v2 = vmul.f32 0.088388346, %v2811_v62  ;;  %v4219_v23 = vsel %vm1493_vm9, %v1439_v37, -1e+30  ;;  %2830 = vmatpush3.msra.mxu1 %v1283_v14  ;;  %v4294_v37 = vld [vmem:[#allocation2 + $0x20] sm:$0xff]  ;;  %v1278_v62 = vld [vmem:[%s3698_s6 + $0x30] sm:$0xff] }
 0x4cb   : > { %v1394_v63 = vpop.f32.mrf.mxu0  ;;  %1547 = vmax.xlane.f32.xlu0 %v4219_v23  ;;  %2831 = vmatprep.subr.mxu1 %v1282_v45 }
 0x4cc   : > { %v1441_v52 = vmul.f32 0.088388346, %v1394_v63  ;;  %v4228_v43 = vsel %vm1496_vm10, %v1442_v2, -1e+30  ;;  %2832 = vmatpush3.msra.mxu1 %v1282_v45 }
 0x4cd   : > { %1549 = vmax.xlane.f32.xlu1 %v4217_v9  ;;  %v2814_v59 = vpop.f32.mrf.mxu0  ;;  %2833 = vmatprep.subr.mxu1 %v1281_v15 }
 0x4ce   : > { %v1444_v56 = vmul.f32 0.088388346, %v2814_v59  ;;  %v4231_v44 = vsel %vm1495_vm11, %v1441_v52, -1e+30  ;;  %2834 = vmatpush3.msra.mxu1 %v1281_v15  ;;  %v1276_v52 = vld [vmem:[%s3698_s6 + $0x20] sm:$0xff] }
 0x4cf   : > { %v1404_v16 = vpop.f32.mrf.mxu0  ;;  %1551 = vmax.xlane.f32.xlu0 %v4231_v44  ;;  %2835 = vmatprep.subr.mxu1 %v1280_v41 }
 0x4d0   : > { %v1443_v42 = vmul.f32 0.088388346, %v1404_v16  ;;  %v4239_v35 = vsel %vm1498_vm12, %v1444_v56, -1e+30  ;;  %2836 = vmatpush3.msra.mxu1 %v1280_v41  ;;  %v4318_v56 = vld [vmem:[#allocation2 + $0x38] sm:$0xff] }
 0x4d1   : > { %1553 = vmax.xlane.f32.xlu1 %v4228_v43  ;;  %v2817_v12 = vpop.f32.mrf.mxu0  ;;  %2837 = vmatprep.subr.mxu1 %v1279_v51  ;;  %v1275_v16 = vld [vmem:[%s3698_s6 + $0x18] sm:$0xff] }
 0x4d2   : > { %v1446_v22 = vmul.f32 0.088388346, %v2817_v12  ;;  %v4241_v3 = vsel %vm1497_vm13, %v1443_v42, -1e+30  ;;  %2838 = vmatpush3.msra.mxu1 %v1279_v51  ;;  %v1274_v42 = vld [vmem:[%s3698_s6 + $0x10] sm:$0xff] }
 0x4d3   : > { %v1414_v24 = vpop.f32.mrf.mxu0  ;;  %1555 = vmax.xlane.f32.xlu0 %v4241_v3  ;;  %2839 = vmatprep.subr.mxu1 %v1278_v62  ;;  %v4363_v51 = vld [vmem:[#allocation2 + $0x70] sm:$0xff] }
 0x4d4   : > { %v1445_v49 = vmul.f32 0.088388346, %v1414_v24  ;;  %v4249_v57 = vsel %vm1500_vm14, %v1446_v22, -1e+30  ;;  %2840 = vmatpush3.msra.mxu1 %v1278_v62  ;;  %v4334_v24 = vld [vmem:[#allocation2 + $0x48] sm:$0xff] }
 0x4d5   : > { %1557 = vmax.xlane.f32.xlu1 %v4239_v35  ;;  %v2820_v29 = vpop.f32.mrf.mxu0  ;;  %2841 = vmatprep.subr.mxu1 %v1277_v25 }
 0x4d6   : > { %v1448_v27 = vmul.f32 0.088388346, %v2820_v29  ;;  %v4251_v13 = vsel %vm1499_vm15, %v1445_v49, -1e+30  ;;  %2842 = vmatpush3.msra.mxu1 %v1277_v25 }
 0x4d7   : > { %1559 = vmax.xlane.f32.xlu0 %v4251_v13  ;;  %v1424_v28 = vpop.f32.mrf.mxu0  ;;  %2843 = vmatprep.subr.mxu1 %v1276_v52 }
 0x4d8   : > { %v1447_v48 = vmul.f32 0.088388346, %v1424_v28  ;;  %v4257_v39 = vsel %vm1502_vm0, %v1448_v27, -1e+30  ;;  %2844 = vmatpush3.msra.mxu1 %v1276_v52  ;;  %v4341_v27 = vld [vmem:[#allocation2 + $0x50] sm:$0xff]  ;;  %v1272_v28 = vld [vmem:[%s3698_s6] sm:$0xff] }
 0x4d9   : > { %1561 = vmax.xlane.f32.xlu1 %v4249_v57  ;;  %2845 = vmatprep.subr.mxu1 %v1275_v16 }
 0x4da   : > { %v4259_v50 = vsel %vm1501_vm1, %v1447_v48, -1e+30  ;;  %2846 = vmatpush3.msra.mxu1 %v1275_v16 }
 0x4db   : > { %1563 = vmax.xlane.f32.xlu0 %v4259_v50  ;;  %2847 = vmatprep.subr.mxu1 %v1274_v42 }
 0x4dc   : > { %2848 = vmatpush3.msra.mxu1 %v1274_v42 }
 0x4dd   : > { %1565 = vmax.xlane.f32.xlu1 %v4257_v39  ;;  %2849 = vmatprep.subr.mxu1 %v1273_v10 }
 0x4de   : > { %2850 = vmatpush3.msra.mxu1 %v1273_v10 }
 0x4df   : > { %2851 = vmatprep.subr.mxu1 %v1272_v28 }
 0x4e0   : > { %2852 = vmatpush3.msra.mxu1 %v1272_v28 }
 0x548   : > { %v1536_v20 = vpop.xlane.xlu0 %1535 }
 0x549   : > { %v4275_v55 = vmax.f32 %v4268_v5, %v1536_v20  ;;  %v4354_v20 = vld [vmem:[#allocation2 + $0x60] sm:$0xff] }
 0x54a   : > { %v1542_v21 = vpop.xlane.xlu1 %1541 }
 0x54b   : > { %2145 = vst.msk [vmem:[#allocation2] sm:$0xff] %vm1839_vm2, %v4275_v55  ;;  %v4283_v58 = vmax.f32 %v4271_v34, %v1542_v21  ;;  %1633 = vperm.xlu0 %3080, %v4275_v55   ;;  %v1583_v12 = vsub.f32 %v4268_v5, %v4275_v55  ;;  %v1532_v55 = vld [vmem:[#allocation2 + $0x68] sm:$0xff] }
 0x54c   : > { %v1538_v36 = vpop.xlane.xlu0 %1537 }
 0x54d   : > { %2148 = vst.msk [vmem:[#allocation2 + $0x18] sm:$0xff] %vm1839_vm2, %v4283_v58  ;;  %v4292_v30 = vmax.f32 %v4277_v46, %v1538_v36  ;;  %v1599_v48 = vmul.f32 1.442695, %v1583_v12  ;;  %v1586_v11 = vsub.f32 %v4271_v34, %v4283_v58 }
 0x54e   : > { %v1540_v0 = vpop.xlane.xlu1 %1539 }
 0x54f   : > { %2146 = vst.msk [vmem:[#allocation2 + $0x8] sm:$0xff] %vm1839_vm2, %v4292_v30  ;;  %v4300_v19 = vmax.f32 %v4286_v47, %v1540_v0  ;;  %1638 = vperm.xlu1 %3081, %v4292_v30   ;;  %3082 = vpow2.f32 %v1599_v48  ;;  %v1605_v34 = vmul.f32 1.442695, %v1586_v11  ;;  %v1584_v25 = vsub.f32 %v4277_v46, %v4292_v30 }
 0x550   : > { %v1544_v2 = vpop.xlane.xlu0 %1543 }
 0x551   : > { %2147 = vst.msk [vmem:[#allocation2 + $0x10] sm:$0xff] %vm1839_vm2, %v4300_v19  ;;  %v4309_v63 = vmax.f32 %v4294_v37, %v1544_v2  ;;  %3084 = vpow2.f32 %v1605_v34  ;;  %v1601_v46 = vmul.f32 1.442695, %v1584_v25  ;;  %v1585_v30 = vsub.f32 %v4286_v47, %v4300_v19 }
 0x552   : > { %v1546_v38 = vpop.xlane.xlu1 %1545 }
 0x553   : > { %v1572_v59 = vmax.f32 %v4303_v40, %v1546_v38  ;;  %1648 = vperm.xlu1 %3081, %v4283_v58   ;;  %2149 = vst.msk [vmem:[#allocation2 + $0x20] sm:$0xff] %vm1839_vm2, %v4309_v63  ;;  %v1587_v47 = vsub.f32 %v4294_v37, %v4309_v63 }
 0x554   : > { %v1548_v26 = vpop.xlane.xlu0 %1547 }
 0x555   : > { %2150 = vst.msk [vmem:[#allocation2 + $0x28] sm:$0xff] %vm1839_vm2, %v1572_v59  ;;  %v4323_v6 = vmax.f32 %v4311_v4, %v1548_v26  ;;  %v1588_v5 = vsub.f32 %v4303_v40, %v1572_v59  ;;  %v4368_v40 = vld [vmem:[#allocation2 + $0x78] sm:$0xff] }
 0x556   : > { %v1550_v53 = vpop.xlane.xlu1 %1549 }
 0x557   : > { %v1574_v22 = vmax.f32 %v4318_v56, %v1550_v53  ;;  %1643 = vperm.xlu1 %3081, %v4300_v19   ;;  %2151 = vst.msk [vmem:[#allocation2 + $0x30] sm:$0xff] %vm1839_vm2, %v4323_v6  ;;  %v1609_v58 = vmul.f32 1.442695, %v1588_v5  ;;  %v1589_v28 = vsub.f32 %v4311_v4, %v4323_v6 }
 0x558   : > { %v1552_v60 = vpop.xlane.xlu0 %1551 }
 0x559   : > { %2152 = vst.msk [vmem:[#allocation2 + $0x38] sm:$0xff] %vm1839_vm2, %v1574_v22  ;;  %v4339_v49 = vmax.f32 %v4325_v17, %v1552_v60  ;;  %v1590_v0 = vsub.f32 %v4318_v56, %v1574_v22  ;;  %3086 = vpow2.f32 %v1609_v58 }
 0x55a   : > { %v1554_v29 = vpop.xlane.xlu1 %1553 }
 0x55b   : > { %v1576_v33 = vmax.f32 %v4334_v24, %v1554_v29  ;;  %1658 = vperm.xlu1 %3081, %v1572_v59   ;;  %2153 = vst.msk [vmem:[#allocation2 + $0x40] sm:$0xff] %vm1839_vm2, %v4339_v49  ;;  %v1613_v59 = vmul.f32 1.442695, %v1590_v0  ;;  %v1607_v29 = vmul.f32 1.442695, %v1587_v47  ;;  %v1591_v11 = vsub.f32 %v4325_v17, %v4339_v49 }
 0x55c   : > { %v1556_v18 = vpop.xlane.xlu0 %1555 }
 0x55d   : > { %2154 = vst.msk [vmem:[#allocation2 + $0x48] sm:$0xff] %vm1839_vm2, %v1576_v33  ;;  %1678 = vperm.xlu0 %3080, %v1576_v33   ;;  %v4351_v14 = vmax.f32 %v4341_v27, %v1556_v18  ;;  %v1592_v56 = vsub.f32 %v4334_v24, %v1576_v33  ;;  %3088 = vpow2.f32 %v1613_v59  ;;  %v1603_v24 = vmul.f32 1.442695, %v1585_v30 }
 0x55e   : > { %v1558_v45 = vpop.xlane.xlu1 %1557  ;;  %3090 = vpow2.f32 %v1601_v46  ;;  %v1615_v4 = vmul.f32 1.442695, %v1591_v11 }
 0x55f   : > { %v1578_v15 = vmax.f32 %v1530_v31, %v1558_v45  ;;  %1653 = vperm.xlu1 %3081, %v4309_v63   ;;  %2155 = vst.msk [vmem:[#allocation2 + $0x50] sm:$0xff] %vm1839_vm2, %v4351_v14  ;;  %v1617_v42 = vmul.f32 1.442695, %v1592_v56  ;;  %v1611_v63 = vmul.f32 1.442695, %v1589_v28 }
 0x560   : > { %v1560_v21 = vpop.xlane.xlu0 %1559 }
 0x561   : > { %2156 = vst.msk [vmem:[#allocation2 + $0x58] sm:$0xff] %vm1839_vm2, %v1578_v15  ;;  %1688 = vperm.xlu0 %3080, %v1578_v15   ;;  %v4361_v41 = vmax.f32 %v4354_v20, %v1560_v21  ;;  %v1594_v12 = vsub.f32 %v1530_v31, %v1578_v15  ;;  %3092 = vpow2.f32 %v1617_v42 }
 0x562   : > { %v1562_v36 = vpop.xlane.xlu1 %1561  ;;  %3094 = vpow2.f32 %v1603_v24 }
 0x563   : > { %v1580_v62 = vmax.f32 %v1532_v55, %v1562_v36  ;;  %1668 = vperm.xlu1 %3081, %v1574_v22   ;;  %2157 = vst.msk [vmem:[#allocation2 + $0x60] sm:$0xff] %vm1839_vm2, %v4361_v41  ;;  %v4393_v22 = vpop.eup %3082  ;;  %v1621_v19 = vmul.f32 1.442695, %v1594_v12 }
 0x564   : > { %v1564_v2 = vpop.xlane.xlu0 %1563  ;;  %v4399_v10 = vpop.eup %3084 }
 0x565   : > { %2158 = vst.msk [vmem:[#allocation2 + $0x68] sm:$0xff] %vm1839_vm2, %v1580_v62  ;;  %1698 = vperm.xlu0 %3080, %v1580_v62   ;;  %v4374_v38 = vmax.f32 %v4363_v51, %v1564_v2  ;;  %v1596_v60 = vsub.f32 %v1532_v55, %v1580_v62  ;;  %3096 = vpow2.f32 %v1621_v19 }
 0x566   : > { %v1566_v52 = vpop.xlane.xlu1 %1565  ;;  %v4404_v48 = vpop.eup %3086  ;;  %3098 = vpow2.f32 %v1607_v29 }
 0x567   : > { %v4378_v26 = vmax.f32 %v4368_v40, %v1566_v52  ;;  %1663 = vperm.xlu1 %3081, %v4323_v6   ;;  %v1597_v16 = vsub.f32 %v4363_v51, %v4374_v38  ;;  %2159 = vst.msk [vmem:[#allocation2 + $0x70] sm:$0xff] %vm1839_vm2, %v4374_v38  ;;  %v1625_v37 = vmul.f32 1.442695, %v1596_v60  ;;  %v1593_v6 = vsub.f32 %v4341_v27, %v4351_v14 }
 0x569   : > { %v1598_v53 = vsub.f32 %v4368_v40, %v4378_v26  ;;  %2160 = vst.msk [vmem:[#allocation2 + $0x78] sm:$0xff] %vm1839_vm2, %v4378_v26  ;;  %1708 = vperm.xlu0 %3080, %v4378_v26   ;;  %3100 = vpow2.f32 %v1625_v37  ;;  %v1619_v17 = vmul.f32 1.442695, %v1593_v6 }
 0x56a   : > { %v4411_v33 = vpop.eup %3088  ;;  %3102 = vpow2.f32 %v1611_v63 }
 0x56b   : > { %1673 = vperm.xlu1 %3081, %v4339_v49   ;;  %v4416_v31 = vpop.eup %3090  ;;  %3104 = vpow2.f32 %v1615_v4  ;;  %v1595_v49 = vsub.f32 %v4354_v20, %v4361_v41 }
 0x56c   : > { %3106 = vpow2.f32 %v1619_v17 }
 0x56d   : > { %1874 = vperm.xlu0 %3080, %v4393_v22  }
 0x56e   : > { %v4419_v18 = vpop.eup %3092 }
 0x56f   : > { %1683 = vperm.xlu1 %3081, %v4351_v14   ;;  %v4424_v5 = vpop.eup %3094  ;;  %v1623_v14 = vmul.f32 1.442695, %v1595_v49 }
 0x571   : > { %1889 = vperm.xlu0 %3080, %v4399_v10   ;;  %3108 = vpow2.f32 %v1623_v14 }
 0x572   : > { %v4427_v27 = vpop.eup %3096 }
 0x573   : > { %1693 = vperm.xlu1 %3081, %v4361_v41   ;;  %v4430_v45 = vpop.eup %3098 }
 0x575   : > { %1899 = vperm.xlu0 %3080, %v4404_v48  }
 0x576   : > { %v4433_v34 = vpop.eup %3100 }
 0x577   : > { %1703 = vperm.xlu1 %3081, %v4374_v38   ;;  %v4436_v20 = vpop.eup %3102 }
 0x578   : > { %v4439_v15 = vpop.eup %3104 }
 0x579   : > { %1909 = vperm.xlu0 %3080, %v4411_v33   ;;  %v4442_v55 = vpop.eup %3106 }
 0x57b   : > { %1879 = vperm.xlu1 %3081, %v4416_v31  }
 0x57d   : > { %1919 = vperm.xlu0 %3080, %v4419_v18  }
 0x57e   : > { %v4445_v21 = vpop.eup %3108 }
 0x57f   : > { %1884 = vperm.xlu1 %3081, %v4424_v5  }
 0x581   : > { %1929 = vperm.xlu0 %3080, %v4427_v27  }
 0x583   : > { %1894 = vperm.xlu1 %3081, %v4430_v45  }
 0x585   : > { %1939 = vperm.xlu0 %3080, %v4433_v34  }
 0x587   : > { %1904 = vperm.xlu1 %3081, %v4436_v20  }
 0x58b   : > { %1914 = vperm.xlu1 %3081, %v4439_v15  }
 0x58f   : > { %1924 = vperm.xlu1 %3081, %v4442_v55  }
 0x593   : > { %1934 = vperm.xlu1 %3081, %v4445_v21  }
 0x5c6   : > { %v1634_v41 = vpop.permute.xlu0 %1633 }
 0x5c7   : > { %v1711_v58 = vsub.f32 %v4181_v32, %v1634_v41 }
 0x5c9   : > { %v1727_v36 = vmul.f32 1.442695, %v1711_v58 }
 0x5ca   : > { %v1639_v0 = vpop.permute.xlu1 %1638 }
 0x5cb   : > { %3110 = vpow2.f32 %v1727_v36  ;;  %v1712_v62 = vsub.f32 %v4192_v7, %v1639_v0 }
 0x5cd   : > { %v1729_v2 = vmul.f32 1.442695, %v1712_v62 }
 0x5ce   : > { %v1649_v25 = vpop.permute.xlu1 %1648 }
 0x5cf   : > { %3112 = vpow2.f32 %v1729_v2  ;;  %v1714_v52 = vsub.f32 %v4188_v54, %v1649_v25 }
 0x5d1   : > { %v1733_v59 = vmul.f32 1.442695, %v1714_v52 }
 0x5d2   : > { %v1644_v56 = vpop.permute.xlu1 %1643 }
 0x5d3   : > { %3114 = vpow2.f32 %v1733_v59  ;;  %v1713_v46 = vsub.f32 %v4194_v61, %v1644_v56 }
 0x5d5   : > { %v1731_v30 = vmul.f32 1.442695, %v1713_v46 }
 0x5d6   : > { %v1659_v42 = vpop.permute.xlu1 %1658 }
 0x5d7   : > { %3116 = vpow2.f32 %v1731_v30  ;;  %v1716_v32 = vsub.f32 %v4204_v8, %v1659_v42 }
 0x5d8   : > { %v3111_v12 = vpop.eup %3110  ;;  %v1679_v24 = vpop.permute.xlu0 %1678 }
 0x5d9   : > { %v1737_v47 = vmul.f32 1.442695, %v1716_v32  ;;  %1791 = vadd.xlane.f32.xlu1 %v3111_v12  ;;  %2853 = vmatprep.mubr.f32.mxu1 %v3111_v12  ;;  %v1720_v8 = vsub.f32 %v4228_v43, %v1679_v24 }
 0x5da   : > { %v1654_v7 = vpop.permute.xlu1 %1653 }
 0x5db   : > { %3118 = vpow2.f32 %v1737_v47  ;;  %v1715_v19 = vsub.f32 %v4207_v1, %v1654_v7  ;;  %v1745_v17 = vmul.f32 1.442695, %v1720_v8 }
 0x5dc   : > { %v3113_v54 = vpop.eup %3112  ;;  %v1689_v29 = vpop.permute.xlu0 %1688 }
 0x5dd   : > { %v1735_v60 = vmul.f32 1.442695, %v1715_v19  ;;  %1793 = vadd.xlane.f32.xlu0 %v3113_v54  ;;  %2854 = vmatmul.mubr.f32.vlgmr.msra.gmra.mxu1 %v3113_v54  ;;  %v1722_v49 = vsub.f32 %v4239_v35, %v1689_v29  ;;  %v1627_v54 = vmul.f32 1.442695, %v1597_v16  ;;  %v1629_v29 = vmul.f32 1.442695, %v1598_v53 }
 0x5de   : > { %v1669_v61 = vpop.permute.xlu1 %1668 }
 0x5df   : > { %3120 = vpow2.f32 %v1735_v60  ;;  %v1718_v28 = vsub.f32 %v4217_v9, %v1669_v61  ;;  %v1749_v58 = vmul.f32 1.442695, %v1722_v49 }
 0x5e0   : > { %v3115_v37 = vpop.eup %3114  ;;  %v1699_v4 = vpop.permute.xlu0 %1698 }
 0x5e1   : > { %v1741_v63 = vmul.f32 1.442695, %v1718_v28  ;;  %1797 = vadd.xlane.f32.xlu1 %v3115_v37  ;;  %v1724_v36 = vsub.f32 %v4249_v57, %v1699_v4 }
 0x5e2   : > { %v1664_v11 = vpop.permute.xlu1 %1663 }
 0x5e3   : > { %3122 = vpow2.f32 %v1741_v63  ;;  %v1717_v6 = vsub.f32 %v4219_v23, %v1664_v11  ;;  %v1753_v25 = vmul.f32 1.442695, %v1724_v36 }
 0x5e4   : > { %v3117_v1 = vpop.eup %3116  ;;  %v1709_v0 = vpop.permute.xlu0 %1708 }
 0x5e5   : > { %v1739_v14 = vmul.f32 1.442695, %v1717_v6  ;;  %1795 = vadd.xlane.f32.xlu0 %v3117_v1  ;;  %2856 = vmatprep.mubr.f32.mxu1 %v3117_v1  ;;  %v1726_v52 = vsub.f32 %v4257_v39, %v1709_v0  ;;  %v1762_v0 = vld [vmem:[#allocation3 + $0x18] sm:$0xff] }
 0x5e6   : > { %v1674_v41 = vpop.permute.xlu1 %1673  ;;  %2857 = vmatmul.mubr.f32.gmra.mxu1 %v3115_v37 }
 0x5e7   : > { %3124 = vpow2.f32 %v1739_v14  ;;  %v1719_v9 = vsub.f32 %v4231_v44, %v1674_v41  ;;  %v1757_v46 = vmul.f32 1.442695, %v1726_v52 }
 0x5e8   : > { %v3119_v43 = vpop.eup %3118  ;;  %3126 = vpow2.f32 %v1745_v17  ;;  %v4478_v16 = vpop.permute.xlu0 %1874  ;;  %v1759_v17 = vld [vmem:[#allocation3] sm:$0xff] }
 0x5e9   : > { %v1743_v62 = vmul.f32 1.442695, %v1719_v9  ;;  %1801 = vadd.xlane.f32.xlu1 %v3119_v43  ;;  %v1775_v49 = vmul.f32 %v4393_v22, %v1759_v17  ;;  %v1760_v9 = vld [vmem:[#allocation3 + $0x8] sm:$0xff]  ;;  %v1769_v17 = vld [vmem:[#allocation3 + $0x50] sm:$0xff] }
 0x5ea   : > { %v1684_v23 = vpop.permute.xlu1 %1683 }
 0x5eb   : > { %3128 = vpow2.f32 %v1743_v62  ;;  %v1721_v35 = vsub.f32 %v4241_v3, %v1684_v23  ;;  %v1778_v23 = vmul.f32 %v4399_v10, %v1762_v0 }
 0x5ec   : > { %v3121_v2 = vpop.eup %3120  ;;  %3130 = vpow2.f32 %v1749_v58  ;;  %v4482_v37 = vpop.permute.xlu0 %1889  ;;  %v1776_v58 = vmul.f32 %v4416_v31, %v1760_v9  ;;  %v1785_v9 = vmul.f32 %v4442_v55, %v1769_v17  ;;  %v1773_v55 = vld [vmem:[#allocation3 + $0x70] sm:$0xff]  ;;  %v1864_v17 = vld [vmem:[#allocation4 + $0x40] sm:$0xff] }
 0x5ed   : > { %v1747_v59 = vmul.f32 1.442695, %v1721_v35  ;;  %1799 = vadd.xlane.f32.xlu0 %v3121_v2  ;;  %2859 = vmatprep.mubr.f32.mxu1 %v3121_v2  ;;  %v1761_v2 = vld [vmem:[#allocation3 + $0x10] sm:$0xff] }
 0x5ee   : > { %v1694_v44 = vpop.permute.xlu1 %1693  ;;  %2860 = vmatmul.mubr.f32.gmra.mxu1 %v3119_v43  ;;  %v1777_v22 = vmul.f32 %v4424_v5, %v1761_v2 }
 0x5ef   : > { %3132 = vpow2.f32 %v1747_v59  ;;  %v1723_v57 = vsub.f32 %v4251_v13, %v1694_v44  ;;  %v1764_v59 = vld [vmem:[#allocation3 + $0x28] sm:$0xff] }
 0x5f0   : > { %v3123_v56 = vpop.eup %3122  ;;  %3134 = vpow2.f32 %v1753_v25  ;;  %v4486_v40 = vpop.permute.xlu0 %1899  ;;  %v1780_v31 = vmul.f32 %v4404_v48, %v1764_v59 }
 0x5f1   : > { %v1751_v30 = vmul.f32 1.442695, %v1723_v57  ;;  %1805 = vadd.xlane.f32.xlu1 %v3123_v56 }
 0x5f2   : > { %v1704_v42 = vpop.permute.xlu1 %1703 }
 0x5f3   : > { %3136 = vpow2.f32 %v1751_v30  ;;  %v1725_v3 = vsub.f32 %v4259_v50, %v1704_v42  ;;  %v1766_v42 = vld [vmem:[#allocation3 + $0x38] sm:$0xff] }
 0x5f4   : > { %v3125_v32 = vpop.eup %3124  ;;  %3138 = vpow2.f32 %v1757_v46  ;;  %v4490_v53 = vpop.permute.xlu0 %1909  ;;  %v1782_v5 = vmul.f32 %v4411_v33, %v1766_v42  ;;  %v1859_v42 = vld [vmem:[#allocation4 + $0x18] sm:$0xff] }
 0x5f5   : > { %v3127_v39 = vpop.eup %3126  ;;  %v1755_v12 = vmul.f32 1.442695, %v1725_v3  ;;  %1803 = vadd.xlane.f32.xlu0 %v3125_v32  ;;  %2862 = vmatprep.mubr.f32.mxu1 %v3125_v32 }
 0x5f6   : > { %1809 = vadd.xlane.f32.xlu1 %v3127_v39  ;;  %2863 = vmatmul.mubr.f32.gmra.mxu1 %v3123_v56  ;;  %v4476_v38 = vpop.permute.xlu1 %1879  ;;  %v1763_v56 = vld [vmem:[#allocation3 + $0x20] sm:$0xff] }
 0x5f7   : > { %3140 = vpow2.f32 %v1755_v12  ;;  %v1779_v10 = vmul.f32 %v4430_v45, %v1763_v56 }
 0x5f8   : > { %v3129_v24 = vpop.eup %3128  ;;  %3142 = vpow2.f32 %v1627_v54  ;;  %v4494_v11 = vpop.permute.xlu0 %1919 }
 0x5f9   : > { %v3131_v13 = vpop.eup %3130  ;;  %1807 = vadd.xlane.f32.xlu0 %v3129_v24  ;;  %2865 = vmatprep.mubr.f32.mxu1 %v3129_v24  ;;  %3144 = vpow2.f32 %v1629_v29  ;;  %v1768_v24 = vld [vmem:[#allocation3 + $0x48] sm:$0xff] }
 0x5fa   : > { %1813 = vadd.xlane.f32.xlu1 %v3131_v13  ;;  %2866 = vmatmul.mubr.f32.gmra.mxu1 %v3127_v39  ;;  %v4480_v28 = vpop.permute.xlu1 %1884  ;;  %v1765_v39 = vld [vmem:[#allocation3 + $0x30] sm:$0xff] }
 0x5fb   : > { %v1781_v48 = vmul.f32 %v4436_v20, %v1765_v39 }
 0x5fc   : > { %v3133_v47 = vpop.eup %3132  ;;  %v4498_v6 = vpop.permute.xlu0 %1929 }
 0x5fd   : > { %v3135_v7 = vpop.eup %3134  ;;  %1811 = vadd.xlane.f32.xlu0 %v3133_v47  ;;  %2868 = vmatprep.mubr.f32.mxu1 %v3133_v47 }
 0x5fe   : > { %1817 = vadd.xlane.f32.xlu1 %v3135_v7  ;;  %2869 = vmatmul.mubr.f32.gmra.mxu1 %v3131_v13  ;;  %v4484_v8 = vpop.permute.xlu1 %1894  ;;  %v1784_v13 = vmul.f32 %v4419_v18, %v1768_v24 }
 0x600   : > { %v3137_v50 = vpop.eup %3136  ;;  %v4503_v14 = vpop.permute.xlu0 %1939 }
 0x601   : > { %v3139_v19 = vpop.eup %3138  ;;  %1815 = vadd.xlane.f32.xlu0 %v3137_v50  ;;  %2871 = vmatprep.mubr.f32.mxu1 %v3137_v50 }
 0x602   : > { %1821 = vadd.xlane.f32.xlu1 %v3139_v19  ;;  %2872 = vmatmul.mubr.f32.gmra.mxu1 %v3135_v7  ;;  %v4488_v26 = vpop.permute.xlu1 %1904  ;;  %v1767_v7 = vld [vmem:[#allocation3 + $0x40] sm:$0xff] }
 0x603   : > { %v1783_v33 = vmul.f32 %v4439_v15, %v1767_v7  ;;  %v1771_v15 = vld [vmem:[#allocation3 + $0x60] sm:$0xff] }
 0x604   : > { %v3141_v60 = vpop.eup %3140 }
 0x605   : > { %1819 = vadd.xlane.f32.xlu0 %v3141_v60  ;;  %2874 = vmatprep.mubr.f32.mxu1 %v3141_v60  ;;  %v4470_v61 = vpop.eup %3142 }
 0x606   : > { %2875 = vmatmul.mubr.f32.gmra.mxu1 %v3139_v19  ;;  %v4473_v51 = vpop.eup %3144  ;;  %v4492_v63 = vpop.permute.xlu1 %1914  ;;  %v1770_v19 = vld [vmem:[#allocation3 + $0x58] sm:$0xff] }
 0x607   : > { %v1786_v60 = vmul.f32 %v4427_v27, %v1770_v19  ;;  %v1862_v19 = vld [vmem:[#allocation4 + $0x8] sm:$0xff] }
 0x60a   : > { %v4496_v4 = vpop.permute.xlu1 %1924 }
 0x60e   : > { %v4500_v1 = vpop.permute.xlu1 %1934 }
 0x613   : > { %1944 = vperm.xlu1 %3081, %v4470_v61  }
 0x61b   : > { %1949 = vperm.xlu0 %3080, %v4473_v51  }
 0x662   : > { %v1792_v41 = vpop.xlane.xlu1 %1791 }
 0x663   : > { %v1823_v43 = vadd.f32 %v1792_v41, %v1775_v49  ;;  %v1772_v41 = vld [vmem:[#allocation3 + $0x68] sm:$0xff] }
 0x665   : > { %1840 = vst.msk [vmem:[#allocation3] sm:$0xff] %vm1839_vm2, %v1823_v43  ;;  %v1788_v43 = vmul.f32 %v4433_v34, %v1772_v41  ;;  %v1789_v34 = vmul.f32 %v4470_v61, %v1773_v55  ;;  %v1858_v61 = vld [vmem:[#allocation4 + $0x58] sm:$0xff] }
 0x666   : > { %v1794_v36 = vpop.xlane.xlu0 %1793 }
 0x667   : > { %v1824_v62 = vadd.f32 %v1794_v36, %v1776_v58 }
 0x669   : > { %1841 = vst.msk [vmem:[#allocation3 + $0x8] sm:$0xff] %vm1839_vm2, %v1824_v62  ;;  %v1774_v62 = vld [vmem:[#allocation3 + $0x78] sm:$0xff] }
 0x66a   : > { %v1798_v35 = vpop.xlane.xlu1 %1797 }
 0x66b   : > { %v1826_v25 = vadd.f32 %v1798_v35, %v1778_v23  ;;  %v1787_v23 = vmul.f32 %v4445_v21, %v1771_v15  ;;  %v1790_v35 = vmul.f32 %v4473_v51, %v1774_v62  ;;  %v1857_v21 = vld [vmem:[#allocation4] sm:$0xff] }
 0x66c   : > { %v1868_v62 = vld [vmem:[#allocation4 + $0x60] sm:$0xff] }
 0x66d   : > { %1843 = vst.msk [vmem:[#allocation3 + $0x18] sm:$0xff] %vm1839_vm2, %v1826_v25 }
 0x66e   : > { %v1796_v52 = vpop.xlane.xlu0 %1795 }
 0x66f   : > { %v1825_v44 = vadd.f32 %v1796_v52, %v1777_v22 }
 0x671   : > { %1842 = vst.msk [vmem:[#allocation3 + $0x10] sm:$0xff] %vm1839_vm2, %v1825_v44 }
 0x672   : > { %v1802_v57 = vpop.xlane.xlu1 %1801 }
 0x673   : > { %v1828_v46 = vadd.f32 %v1802_v57, %v1780_v31  ;;  %v1856_v31 = vld [vmem:[#allocation4 + $0x30] sm:$0xff]  ;;  %v1953_v57 = vmul.f32 %v4476_v38, %v1857_v21  ;;  %v1861_v38 = vld [vmem:[#allocation4 + $0x68] sm:$0xff] }
 0x674   : > { %v1952_v56 = vmul.f32 %v4478_v16, %v1856_v31  ;;  %v1957_v16 = vmul.f32 %v4486_v40, %v1861_v38 }
 0x675   : > { %1845 = vst.msk [vmem:[#allocation3 + $0x28] sm:$0xff] %vm1839_vm2, %v1828_v46 }
 0x676   : > { %v1800_v30 = vpop.xlane.xlu0 %1799 }
 0x677   : > { %v1827_v3 = vadd.f32 %v1800_v30, %v1779_v10 }
 0x679   : > { %1844 = vst.msk [vmem:[#allocation3 + $0x20] sm:$0xff] %vm1839_vm2, %v1827_v3  ;;  %v1955_v3 = vmul.f32 %v4482_v37, %v1859_v42  ;;  %v1863_v37 = vld [vmem:[#allocation4 + $0x48] sm:$0xff] }
 0x67a   : > { %v1806_v32 = vpop.xlane.xlu1 %1805 }
 0x67b   : > { %v1830_v12 = vadd.f32 %v1806_v32, %v1782_v5  ;;  %v1954_v32 = vmul.f32 %v4480_v28, %v1858_v61  ;;  %v1959_v28 = vmul.f32 %v4490_v53, %v1863_v37 }
 0x67d   : > { %1847 = vst.msk [vmem:[#allocation3 + $0x38] sm:$0xff] %vm1839_vm2, %v1830_v12 }
 0x67e   : > { %v1804_v47 = vpop.xlane.xlu0 %1803 }
 0x67f   : > { %v1810_v45 = vpop.xlane.xlu1 %1809  ;;  %v1829_v50 = vadd.f32 %v1804_v47, %v1781_v48  ;;  %v1860_v48 = vld [vmem:[#allocation4 + $0x50] sm:$0xff] }
 0x680   : > { %v1832_v54 = vadd.f32 %v1810_v45, %v1784_v13  ;;  %v1956_v47 = vmul.f32 %v4484_v8, %v1860_v48 }
 0x681   : > { %1846 = vst.msk [vmem:[#allocation3 + $0x30] sm:$0xff] %vm1839_vm2, %v1829_v50 }
 0x682   : > { %1849 = vst.msk [vmem:[#allocation3 + $0x48] sm:$0xff] %vm1839_vm2, %v1832_v54  ;;  %v1808_v29 = vpop.xlane.xlu0 %1807  ;;  %v1865_v54 = vld [vmem:[#allocation4 + $0x20] sm:$0xff] }
 0x683   : > { %v1814_v49 = vpop.xlane.xlu1 %1813  ;;  %v1831_v20 = vadd.f32 %v1808_v29, %v1783_v33  ;;  %v1961_v40 = vmul.f32 %v4494_v11, %v1865_v54 }
 0x684   : > { %v1834_v18 = vadd.f32 %v1814_v49, %v1786_v60  ;;  %v1958_v60 = vmul.f32 %v4488_v26, %v1862_v19  ;;  %v1869_v26 = vld [vmem:[#allocation4 + $0x70] sm:$0xff] }
 0x685   : > { %1848 = vst.msk [vmem:[#allocation3 + $0x40] sm:$0xff] %vm1839_vm2, %v1831_v20  ;;  %v1867_v20 = vld [vmem:[#allocation4 + $0x38] sm:$0xff] }
 0x686   : > { %1851 = vst.msk [vmem:[#allocation3 + $0x58] sm:$0xff] %vm1839_vm2, %v1834_v18  ;;  %v1812_v58 = vpop.xlane.xlu0 %1811  ;;  %v1960_v18 = vmul.f32 %v4492_v63, %v1864_v17  ;;  %v1963_v53 = vmul.f32 %v4498_v6, %v1867_v20 }
 0x687   : > { %v1818_v36 = vpop.xlane.xlu1 %1817  ;;  %v1833_v0 = vadd.f32 %v1812_v58, %v1785_v9 }
 0x688   : > { %v1836_v27 = vadd.f32 %v1818_v36, %v1788_v43  ;;  %v1866_v43 = vld [vmem:[#allocation4 + $0x10] sm:$0xff] }
 0x689   : > { %1850 = vst.msk [vmem:[#allocation3 + $0x50] sm:$0xff] %vm1839_vm2, %v1833_v0  ;;  %v1962_v0 = vmul.f32 %v4496_v4, %v1866_v43 }
 0x68a   : > { %1853 = vst.msk [vmem:[#allocation3 + $0x68] sm:$0xff] %vm1839_vm2, %v1836_v27  ;;  %v1816_v2 = vpop.xlane.xlu0 %1815 }
 0x68b   : > { %v1822_v25 = vpop.xlane.xlu1 %1821  ;;  %v1835_v22 = vadd.f32 %v1816_v2, %v1787_v23  ;;  %v1965_v23 = vmul.f32 %v4503_v14, %v1869_v26 }
 0x68c   : > { %v1838_v52 = vadd.f32 %v1822_v25, %v1790_v35  ;;  %v1871_v35 = vld [vmem:[#allocation4 + $0x28] sm:$0xff]  ;;  %v1964_v25 = vmul.f32 %v4500_v1, %v1868_v62 }
 0x68d   : > { %1852 = vst.msk [vmem:[#allocation3 + $0x60] sm:$0xff] %vm1839_vm2, %v1835_v22  ;;  %v1870_v22 = vld [vmem:[#allocation4 + $0x78] sm:$0xff] }
 0x68e   : > { %1855 = vst.msk [vmem:[#allocation3 + $0x78] sm:$0xff] %vm1839_vm2, %v1838_v52  ;;  %v1820_v59 = vpop.xlane.xlu0 %1819 }
 0x68f   : > { %v1837_v44 = vadd.f32 %v1820_v59, %v1789_v34  ;;  %v1945_v52 = vpop.permute.xlu1 %1944 }
 0x690   : > { %v1966_v21 = vmul.f32 %v1945_v52, %v1870_v22 }
 0x691   : > { %1854 = vst.msk [vmem:[#allocation3 + $0x70] sm:$0xff] %vm1839_vm2, %v1837_v44 }
 0x696   : > { %v1950_v2 = vpop.permute.xlu0 %1949 }
 0x697   : > { %v1967_v59 = vmul.f32 %v1950_v2, %v1871_v35 }
 0x69d   : > { %v2855_v51 = vpop.f32.mrf.mxu1 }
 0x69e   : > { %v2114_v46 = vadd.f32 %v2855_v51, %v1953_v57 }
 0x69f   : > { %v2034_v10 = vpop.f32.mrf.mxu1 }
 0x6a0   : > { %2130 = vst [vmem:[#allocation4] sm:$0xff] %v2114_v46  ;;  %v2113_v30 = vadd.f32 %v2034_v10, %v1952_v56 }
 0x6a2   : > { %2129 = vst [vmem:[#allocation4 + $0x30] sm:$0xff] %v2113_v30 }
 0x6a6   : > { %v2858_v5 = vpop.f32.mrf.mxu1 }
 0x6a7   : > { %v2116_v39 = vadd.f32 %v2858_v5, %v1955_v3 }
 0x6a8   : > { %v2044_v12 = vpop.f32.mrf.mxu1 }
 0x6a9   : > { %2132 = vst [vmem:[#allocation4 + $0x18] sm:$0xff] %v2116_v39  ;;  %v2115_v24 = vadd.f32 %v2044_v12, %v1954_v32 }
 0x6ab   : > { %2131 = vst [vmem:[#allocation4 + $0x58] sm:$0xff] %v2115_v24 }
 0x6ae   : > { %v2861_v13 = vpop.f32.mrf.mxu1 }
 0x6af   : > { %v2118_v7 = vadd.f32 %v2861_v13, %v1957_v16 }
 0x6b0   : > { %v2054_v45 = vpop.f32.mrf.mxu1 }
 0x6b1   : > { %2134 = vst [vmem:[#allocation4 + $0x68] sm:$0xff] %v2118_v7  ;;  %v2117_v50 = vadd.f32 %v2054_v45, %v1956_v47 }
 0x6b3   : > { %2133 = vst [vmem:[#allocation4 + $0x50] sm:$0xff] %v2117_v50 }
 0x6b6   : > { %v2864_v33 = vpop.f32.mrf.mxu1 }
 0x6b7   : > { %v2120_v29 = vadd.f32 %v2864_v33, %v1959_v28 }
 0x6b8   : > { %v2064_v49 = vpop.f32.mrf.mxu1 }
 0x6b9   : > { %2136 = vst [vmem:[#allocation4 + $0x48] sm:$0xff] %v2120_v29  ;;  %v2119_v8 = vadd.f32 %v2064_v49, %v1958_v60 }
 0x6ba   : > { %v2867_v41 = vpop.f32.mrf.mxu1 }
 0x6bb   : > { %2135 = vst [vmem:[#allocation4 + $0x8] sm:$0xff] %v2119_v8  ;;  %v2122_v9 = vadd.f32 %v2867_v41, %v1961_v40 }
 0x6bc   : > { %v2074_v58 = vpop.f32.mrf.mxu1 }
 0x6bd   : > { %2138 = vst [vmem:[#allocation4 + $0x20] sm:$0xff] %v2122_v9  ;;  %v2121_v15 = vadd.f32 %v2074_v58, %v1960_v18 }
 0x6be   : > { %v2870_v36 = vpop.f32.mrf.mxu1 }
 0x6bf   : > { %2137 = vst [vmem:[#allocation4 + $0x40] sm:$0xff] %v2121_v15  ;;  %v2124_v11 = vadd.f32 %v2870_v36, %v1963_v53 }
 0x6c0   : > { %v2084_v27 = vpop.f32.mrf.mxu1 }
 0x6c1   : > { %2140 = vst [vmem:[#allocation4 + $0x38] sm:$0xff] %v2124_v11  ;;  %v2123_v63 = vadd.f32 %v2084_v27, %v1962_v0 }
 0x6c2   : > { %v2873_v55 = vpop.f32.mrf.mxu1 }
 0x6c3   : > { %2139 = vst [vmem:[#allocation4 + $0x10] sm:$0xff] %v2123_v63  ;;  %v2126_v6 = vadd.f32 %v2873_v55, %v1965_v23 }
 0x6c4   : > { %v2094_v34 = vpop.f32.mrf.mxu1 }
 0x6c5   : > { %2142 = vst [vmem:[#allocation4 + $0x70] sm:$0xff] %v2126_v6  ;;  %v2125_v4 = vadd.f32 %v2094_v34, %v1964_v25 }
 0x6c6   : > { %v2876_v44 = vpop.f32.mrf.mxu1 }
 0x6c7   : > { %2141 = vst [vmem:[#allocation4 + $0x60] sm:$0xff] %v2125_v4  ;;  %v2128_v31 = vadd.f32 %v2876_v44, %v1967_v59 }
 0x6c8   : > { %v2104_v14 = vpop.f32.mrf.mxu1 }
 0x6c9   : > { %2144 = vst [vmem:[#allocation4 + $0x28] sm:$0xff] %v2128_v31  ;;  %v2127_v57 = vadd.f32 %v2104_v14, %v1966_v21 }
 0x6cb   : > { %2143 = vst [vmem:[#allocation4 + $0x78] sm:$0xff] %v2127_v57 }
 0x6cc PF: > { %p2514_p10 = scmp.ne.s32.totalorder %s3380_s18, 1 }
 0x6ce   : > { %2164 = sbr.rel (%p2514_p10) target bundleno = 1918 (0x77e), region = 60 }
 0x6d3   : > { %v2167_v1 = vld [vmem:[#allocation3 + $0x10] sm:$0xff]  ;;  %v2165_v51 = vld [vmem:[#allocation3] sm:$0xff]  ;;  %v2168_v56 = vld [vmem:[#allocation3 + $0x18] sm:$0xff]  ;;  %v3415_v46 = vmov 0  }
 0x6d4   : > { %3147 = vset.pattern.permute.xlu1 %v3415_v46  ;;  %3146 = vset.pattern.permute.xlu0 %v3415_v46  ;;  %3148 = vrcp.f32 %v2167_v1  ;;  %v2166_v10 = vld [vmem:[#allocation3 + $0x8] sm:$0xff]  ;;  %v2169_v42 = vld [vmem:[#allocation3 + $0x20] sm:$0xff]  ;;  %v2172_v61 = vld [vmem:[#allocation3 + $0x38] sm:$0xff] }
 0x6d5   : > { %3150 = vrcp.f32 %v2165_v51  ;;  %v2170_v30 = vld [vmem:[#allocation3 + $0x28] sm:$0xff]  ;;  %v2171_v3 = vld [vmem:[#allocation3 + $0x30] sm:$0xff]  ;;  %v2173_v32 = vld [vmem:[#allocation3 + $0x40] sm:$0xff] }
 0x6d6   : > { %3152 = vrcp.f32 %v2168_v56  ;;  %v2174_v5 = vld [vmem:[#allocation3 + $0x48] sm:$0xff]  ;;  %v2176_v38 = vld [vmem:[#allocation3 + $0x58] sm:$0xff]  ;;  %v2175_v16 = vld [vmem:[#allocation3 + $0x50] sm:$0xff] }
 0x6d7   : > { %3154 = vrcp.f32 %v2166_v10  ;;  %v2178_v47 = vld [vmem:[#allocation3 + $0x68] sm:$0xff]  ;;  %v2177_v45 = vld [vmem:[#allocation3 + $0x60] sm:$0xff]  ;;  %v2180_v37 = vld [vmem:[#allocation3 + $0x78] sm:$0xff] }
 0x6d8   : > { %3156 = vrcp.f32 %v2170_v30  ;;  %v2179_v28 = vld [vmem:[#allocation3 + $0x70] sm:$0xff]  ;;  %v2199_v20 = vld [vmem:[#allocation4 + $0x58] sm:$0xff]  ;;  %v2198_v15 = vld [vmem:[#allocation4] sm:$0xff] }
 0x6d9   : > { %3158 = vrcp.f32 %v2169_v42  ;;  %v2197_v41 = vld [vmem:[#allocation4 + $0x30] sm:$0xff]  ;;  %v2200_v53 = vld [vmem:[#allocation4 + $0x18] sm:$0xff]  ;;  %v2202_v62 = vld [vmem:[#allocation4 + $0x68] sm:$0xff] }
 0x6da   : > { %3160 = vrcp.f32 %v2172_v61  ;;  %v2201_v27 = vld [vmem:[#allocation4 + $0x50] sm:$0xff]  ;;  %v2204_v55 = vld [vmem:[#allocation4 + $0x48] sm:$0xff]  ;;  %v2206_v59 = vld [vmem:[#allocation4 + $0x20] sm:$0xff] }
 0x6db   : > { %3162 = vrcp.f32 %v2171_v3  ;;  %v2203_v25 = vld [vmem:[#allocation4 + $0x8] sm:$0xff]  ;;  %v2205_v4 = vld [vmem:[#allocation4 + $0x40] sm:$0xff]  ;;  %v2208_v57 = vld [vmem:[#allocation4 + $0x38] sm:$0xff] }
 0x6dc   : > { %3164 = vrcp.f32 %v2174_v5  ;;  %v2207_v1 = vld [vmem:[#allocation4 + $0x10] sm:$0xff]  ;;  %v2209_v42 = vld [vmem:[#allocation4 + $0x60] sm:$0xff] }
 0x6dd   : > { %3166 = vrcp.f32 %v2173_v32  ;;  %v2210_v30 = vld [vmem:[#allocation4 + $0x70] sm:$0xff] }
 0x6de   : > { %3168 = vrcp.f32 %v2176_v38 }
 0x6df   : > { %3170 = vrcp.f32 %v2175_v16 }
 0x6e0   : > { %3172 = vrcp.f32 %v2178_v47 }
 0x6e1   : > { %v3149_v39 = vpop.eup %3148  ;;  %3174 = vrcp.f32 %v2177_v45 }
 0x6e2   : > { %v3151_v12 = vpop.eup %3150  ;;  %2225 = vperm.xlu1 %3147, %v3149_v39   ;;  %3176 = vrcp.f32 %v2180_v37  ;;  %v2212_v39 = vld [vmem:[#allocation4 + $0x28] sm:$0xff] }
 0x6e3   : > { %v3153_v24 = vpop.eup %3152  ;;  %2215 = vperm.xlu0 %3146, %v3151_v12   ;;  %3178 = vrcp.f32 %v2179_v28  ;;  %v2211_v12 = vld [vmem:[#allocation4 + $0x78] sm:$0xff] }
 0x6e4   : > { %v3155_v48 = vpop.eup %3154 }
 0x6e5   : > { %v3157_v13 = vpop.eup %3156 }
 0x6e6   : > { %2230 = vperm.xlu1 %3147, %v3153_v24   ;;  %v3159_v7 = vpop.eup %3158 }
 0x6e7   : > { %2220 = vperm.xlu0 %3146, %v3155_v48   ;;  %v3161_v50 = vpop.eup %3160 }
 0x6e8   : > { %v3163_v19 = vpop.eup %3162 }
 0x6e9   : > { %v3165_v54 = vpop.eup %3164 }
 0x6ea   : > { %2240 = vperm.xlu1 %3147, %v3157_v13   ;;  %v3167_v33 = vpop.eup %3166 }
 0x6eb   : > { %2235 = vperm.xlu0 %3146, %v3159_v7   ;;  %v3169_v60 = vpop.eup %3168 }
 0x6ec   : > { %v3171_v29 = vpop.eup %3170 }
 0x6ed   : > { %v3173_v17 = vpop.eup %3172 }
 0x6ee   : > { %2250 = vperm.xlu1 %3147, %v3161_v50   ;;  %v3175_v49 = vpop.eup %3174 }
 0x6ef   : > { %2245 = vperm.xlu0 %3146, %v3163_v19   ;;  %v3177_v40 = vpop.eup %3176 }
 0x6f0   : > { %v3179_v8 = vpop.eup %3178 }
 0x6f2   : > { %2260 = vperm.xlu1 %3147, %v3165_v54  }
 0x6f3   : > { %2255 = vperm.xlu0 %3146, %v3167_v33  }
 0x6f6   : > { %2270 = vperm.xlu1 %3147, %v3169_v60  }
 0x6f7   : > { %2265 = vperm.xlu0 %3146, %v3171_v29  }
 0x6fa   : > { %2280 = vperm.xlu1 %3147, %v3173_v17  }
 0x6fb   : > { %2275 = vperm.xlu0 %3146, %v3175_v49  }
 0x6fe   : > { %2290 = vperm.xlu1 %3147, %v3177_v40  }
 0x6ff   : > { %2285 = vperm.xlu0 %3146, %v3179_v8  }
 0x75d   : > { %v2226_v18 = vpop.permute.xlu1 %2225 }
 0x75e   : > { %v2295_v9 = vmul.f32 %v2226_v18, %v2199_v20  ;;  %v2216_v43 = vpop.permute.xlu0 %2215 }
 0x75f   : > { %v2293_v58 = vmul.f32 %v2216_v43, %v2197_v41 }
 0x760   : > { %2311 = vst [vmem:[%s3700_s28 + $0x10] sm:$0xff] %v2295_v9 }
 0x761   : > { %2309 = vst [vmem:[%s3700_s28] sm:$0xff] %v2293_v58  ;;  %v2231_v26 = vpop.permute.xlu1 %2230 }
 0x762   : > { %v2296_v36 = vmul.f32 %v2231_v26, %v2200_v53  ;;  %v2221_v0 = vpop.permute.xlu0 %2220 }
 0x763   : > { %v2294_v11 = vmul.f32 %v2221_v0, %v2198_v15 }
 0x764   : > { %2312 = vst [vmem:[%s3700_s28 + $0x18] sm:$0xff] %v2296_v36 }
 0x765   : > { %2310 = vst [vmem:[%s3700_s28 + $0x8] sm:$0xff] %v2294_v11  ;;  %v2241_v23 = vpop.permute.xlu1 %2240 }
 0x766   : > { %v2298_v63 = vmul.f32 %v2241_v23, %v2202_v62  ;;  %v2236_v35 = vpop.permute.xlu0 %2235 }
 0x767   : > { %v2297_v2 = vmul.f32 %v2236_v35, %v2201_v27 }
 0x768   : > { %2314 = vst [vmem:[%s3700_s28 + $0x28] sm:$0xff] %v2298_v63 }
 0x769   : > { %2313 = vst [vmem:[%s3700_s28 + $0x20] sm:$0xff] %v2297_v2  ;;  %v2251_v6 = vpop.permute.xlu1 %2250 }
 0x76a   : > { %v2300_v22 = vmul.f32 %v2251_v6, %v2204_v55  ;;  %v2246_v52 = vpop.permute.xlu0 %2245 }
 0x76b   : > { %v2299_v34 = vmul.f32 %v2246_v52, %v2203_v25 }
 0x76c   : > { %2316 = vst [vmem:[%s3700_s28 + $0x38] sm:$0xff] %v2300_v22 }
 0x76d   : > { %2315 = vst [vmem:[%s3700_s28 + $0x30] sm:$0xff] %v2299_v34  ;;  %v2261_v44 = vpop.permute.xlu1 %2260 }
 0x76e   : > { %v2302_v21 = vmul.f32 %v2261_v44, %v2206_v59  ;;  %v2256_v31 = vpop.permute.xlu0 %2255 }
 0x76f   : > { %v2301_v14 = vmul.f32 %v2256_v31, %v2205_v4 }
 0x770   : > { %2318 = vst [vmem:[%s3700_s28 + $0x48] sm:$0xff] %v2302_v21 }
 0x771   : > { %2317 = vst [vmem:[%s3700_s28 + $0x40] sm:$0xff] %v2301_v14  ;;  %v2271_v51 = vpop.permute.xlu1 %2270 }
 0x772   : > { %v2304_v56 = vmul.f32 %v2271_v51, %v2208_v57  ;;  %v2266_v46 = vpop.permute.xlu0 %2265 }
 0x773   : > { %v2303_v10 = vmul.f32 %v2266_v46, %v2207_v1 }
 0x774   : > { %2320 = vst [vmem:[%s3700_s28 + $0x58] sm:$0xff] %v2304_v56 }
 0x775   : > { %2319 = vst [vmem:[%s3700_s28 + $0x50] sm:$0xff] %v2303_v10  ;;  %v2281_v61 = vpop.permute.xlu1 %2280 }
 0x776   : > { %v2306_v3 = vmul.f32 %v2281_v61, %v2210_v30  ;;  %v2276_v5 = vpop.permute.xlu0 %2275 }
 0x777   : > { %v2305_v32 = vmul.f32 %v2276_v5, %v2209_v42 }
 0x778   : > { %2322 = vst [vmem:[%s3700_s28 + $0x68] sm:$0xff] %v2306_v3 }
 0x779   : > { %2321 = vst [vmem:[%s3700_s28 + $0x60] sm:$0xff] %v2305_v32  ;;  %v2291_v24 = vpop.permute.xlu1 %2290 }
 0x77a   : > { %v2308_v38 = vmul.f32 %v2291_v24, %v2212_v39  ;;  %v2286_v48 = vpop.permute.xlu0 %2285 }
 0x77b   : > { %v2307_v16 = vmul.f32 %v2286_v48, %v2211_v12 }
 0x77c   : > { %2324 = vst [vmem:[%s3700_s28 + $0x78] sm:$0xff] %v2308_v38 }
 0x77d   : > { %2323 = vst [vmem:[%s3700_s28 + $0x70] sm:$0xff] %v2307_v16 }
 0x77e PF: > { %s4696_s18 = sld [smem:[#allocation16_spill]]  ;;  %s2341_s25 = sshll.u32 %s3700_s28, 4  ;;  %s4570_s25 = int_to_ptr.vmem [resolvable:$true] %s2341_s25 }
 0x77f   : > { %s4697_s30 = sld [smem:[#allocation17_spill]]  ;;  %s2326_s12 = scalar_lea.sflag [#allocation7], %s3680_s5 }
 0x780   : > { %s4698_s4 = sld [smem:[#allocation27_spill]]  ;;  %s3264_s6 = scalar_lea.vmem %s4570_s25, 2048 }
 0x781   : > { %p3265_p12 = scmp.ne.s32.totalorder %s4570_s25, %s3264_s6  ;;  %p4699_p11 = scmp.ne.s32.totalorder %s4687_s26, 0 }
 0x782   : > { %s3416_s27 = smov [#allocation11]  }
 0x783   : > { %p3266_p2 = pnand %p3265_p12, %p4699_p11  ;;  %s3268_s28 = sshll.u32 %s3416_s27, 4  ;;  %s3269_s28 = int_to_ptr.vmem [resolvable:$false] %s3268_s28 }
 0x784   : > { %s2516_s20 = sshll.u32 %s4696_s18, 4  ;;  %s3270_s11 = scalar_lea.vmem %s3269_s28, 4096 }
 0x785   : > { %s2517_s9 = sshll.u32 %s4697_s30, 5  ;;  %p3267_p5 = pneg %p3266_p2 }
 0x786   : > { %s2338_s29 = sadd.s32 %s2517_s9, %s2516_s20  ;;  %p3271_p0 = scmp.lt.s32.totalorder %s4570_s25, %s3269_s28 }
 0x787   : > { %s2518_s8 = sshll.u32 %s2338_s29, 7  ;;  %p3272_p1 = scmp.lt.s32.totalorder %s3270_s11, %s3264_s6 }
 0x788   : > { %s4575_s3 = scalar_lea.hbm %s4698_s4, %s2518_s8 }
 0x789   : > { %p3273_p7 = por %p3272_p1, %p3271_p0 }
 0x78b   : > { %p3274_p8 = pnand %p3273_p7, %p3267_p5 }
 0x78d   : > { %3277 = shalt.err (!%p3274_p8)
}
 0x78e   : > { %s3278_s19 = scalar_lea.hbm %s4575_s3, 2048  ;;  %s3282_s7 = scalar_lea.hbm %s4698_s4, 16384 }
 0x78f   : > { %p3279_p13 = scmp.ne.s32.totalorder %s4575_s3, %s3278_s19  ;;  %p3283_p4 = scmp.lt.s32.totalorder %s4575_s3, %s4698_s4 }
 0x790   : > { %p3284_p9 = scmp.lt.s32.totalorder %s3282_s7, %s3278_s19 }
 0x791   : > { %p3280_p6 = pnand %p3279_p13, %p4699_p11 }
 0x792   : > { %p3285_p10 = por %p3284_p9, %p3283_p4 }
 0x793   : > { %p3281_p3 = pneg %p3280_p6 }
 0x795   : > { %p3286_p12 = pnand %p3285_p10, %p3281_p3 }
 0x797   : > { %3289 = shalt.err (!%p3286_p12)
}
 0x798   : > { %s3417_s30 = smov 128   ;;  %s3418_s20 = smov 8  }
 0x799   : > { %2883 = dma.vmem_to_hbm [thread:$0]  (%p4699_p11), %s4570_s25, 2048, %s4575_s3, %s2326_s12, %s3417_s30, %s3417_s30, %s3418_s20  }
 0x79a PF: > { %p2900_p2 = scmp.ge.s32.totalorder %s3404_s24, 2  ;;  %s2356_s9 = sand.u32 1, %s3368_s15  }
 0x79b   : > { %p4700_p5 = scmp.ne.s32.totalorder %s4688_s10, 0  ;;  %s2357_s29 = scalar_lea.sflag [#allocation7], %s2356_s9 }
 0x79d   : > { %p2896_p0 = pnand %p2900_p2, %p4700_p5 }
 0x79f   : > { %p2897_p1 = pneg %p2896_p0 }
 0x7a1   : > { %3351 = dma.done.wait (%p2897_p1), %s2357_s29, 2048  }
 0x7a2   : > { %3353 = vsyncadd (%p2897_p1), %s2357_s29, 4294965248  ;;  %s22_s24 = sadd.s32 1, %s3404_s24   ;;  %s4702_s26 = sld [smem:[#allocation15_spill]] }
 0x7a3   : > { %p4605_p7 = scmp.ge.s32.totalorder %s22_s24, 18   ;;  %s4703_s14 = sld [smem:[#allocation23_spill]] }
 0x7a4   : > { %s4704_s5 = sld [smem:[#allocation24_spill]]  ;;  %s4710_s12 = smov %s3360_s13 }
 0x7a5   : > { %s4705_s18 = sld [smem:[#allocation18_spill]]  ;;  %s4712_s15 = smov %s3372_s16 }
 0x7a6   : > { %s4706_s19 = sld [smem:[#allocation19_spill]]  ;;  %s4713_s16 = smov %s3376_s17 }
 0x7a7   : > { %s4707_s21 = sld [smem:[#allocation20_spill]]  ;;  %s4715_s20 = smov %s3400_s23 }
 0x7a8   : > { %s4708_s22 = sld [smem:[#allocation21_spill]]  ;;  %s4711_s13 = smov %s4702_s26 }
 0x7a9   : > { %s4709_s10 = sld [smem:[#allocation22_spill]] }
 0x7aa   : > { %s4714_s17 = smov %s4704_s5 }
 0x7ab   :  { %21 = sbr.rel (!%p4605_p7) target bundleno = 16 (0x10), region = 117 }
 0x7af   : > { %s4716_s23 = smov %s4709_s10 }
 0x7b0   :  { %2362 = vsyncpa [#allocation6], 1 }
 0x7b1   :  { %2364 = vsyncpa [#allocation6 + $0x1], 1 }
 0x7b2   :  { %2365 = vsyncpa [#allocation9], 1 }
 0x7b3   :  { %2367 = vsyncpa [#allocation9 + $0x1], 1 }
 0x7b4   :  { %2368 = vsyncpa [#allocation7], 1 }
 0x7b5   :  { %2370 = vsyncpa [#allocation7 + $0x1], 1 }

</bundles_post_ra>
